<compile_context>
chip_gen: v7x
topology: tpu7x:2x2x1
jax: 0.10.0
libtpu: 0.0.40
codegen_flags: <defaults>
</compile_context>

<pallas_src>
import functools

import jax
import jax.numpy as jnp
from jax.experimental import pallas as pl
from jax.experimental.pallas import tpu as pltpu  # noqa: F401  (see v7x TODO)


LANE = 128  # lane width; latent dim is zero-padded to a multiple of this


def _round_up(x, m):
    return ((x + m - 1) // m) * m


# ----------------------------------------------------------------------------
# In-kernel helpers (bf16 matmuls with f32 accumulation, fused attention)
# ----------------------------------------------------------------------------

def _mm(a, b):
    """a @ b in bf16 with f32 accumulation (MXU)."""
    return jnp.dot(a.astype(jnp.bfloat16), b.astype(jnp.bfloat16),
                   preferred_element_type=jnp.float32)


def _mm_t(a, b):
    """a @ b.T (contract last dims) in bf16 with f32 accumulation."""
    return jax.lax.dot_general(
        a.astype(jnp.bfloat16), b.astype(jnp.bfloat16),
        (((1,), (1,)), ((), ())), preferred_element_type=jnp.float32)


def _softmax_rows(s):
    s = s - jnp.max(s, axis=-1, keepdims=True)
    p = jnp.exp(s)
    return p * pl.reciprocal(jnp.sum(p, axis=-1, keepdims=True), approx=True)


def _attend_q(q, ctx, wkv, bkv, wo, bo, cp):
    """Single-head cross attention given a pre-projected (pre-scaled) q.

    K and V are fused into one (cp, 2*cp) weight -> one MXU pass over ctx."""
    kv = _mm(ctx, wkv[...]) + bkv[...]
    k = kv[:, :cp]
    v = kv[:, cp:]
    p = _softmax_rows(_mm_t(q, k))
    return _mm(_mm(p, v), wo[...]) + bo[...]


def _point_mlp(pts, w1, b1, w2, b2):
    h = jnp.maximum(_mm(pts, w1[...]) + b1[...], 0.0)
    return _mm(h, w2[...]) + b2[...]


# ----------------------------------------------------------------------------
# Fused Pallas kernels
# ----------------------------------------------------------------------------

def _predict_kernel(ee_ref, zcur_ref, zphi_ref,
                    ew1, eb1, ew2, eb2,
                    aWq, aBq, aWkv, aBkv, aWo, aBo,
                    cWq, cBq, cWkv, cBkv, cWo, cBo,
                    znxt_ref, *, cp):
    """encode(ee) [one or two point clouds] + condition(z_cur, context=z_e)."""
    b_sz, p_sz = ee_ref.shape[0], ee_ref.shape[1]
    # Aggregate queries come from the constant z_phi embedding -> compute once
    # per call (softmax scale is folded into aWq at init).
    q_agg = _mm(zphi_ref[...], aWq[...]) + aBq[...]                  # (Q, CP)
    for b in range(b_sz):
        toks = []
        for p in range(p_sz):
            z_obs = _point_mlp(ee_ref[b, p], ew1, eb1, ew2, eb2)     # (N, CP)
            z_agg = _attend_q(q_agg, z_obs, aWkv, aBkv, aWo, aBo, cp)
            toks.append(z_agg)                                       # (Q, CP)
            toks.append(jnp.mean(z_agg, axis=0, keepdims=True))      # 'mean' tok
        z_e = jnp.concatenate(toks, axis=0)                          # (P*(Q+1), CP)
        # condition: z_cur attends over z_e.  (Encode output is .detach()ed in
        # the reference; this is forward-only, so it's a numerical no-op.)
        q_c = _mm(zcur_ref[b], cWq[...]) + cBq[...]                  # (L, CP)
        znxt_ref[b] = _attend_q(q_c, z_e, cWkv, cBkv, cWo, cBo,
                                cp).astype(znxt_ref.dtype)


def _decode_kernel(qpts_ref, z_ref, zpi_ref,
                   ew1, eb1, ew2, eb2,
                   sWq, sBq, sWkv, sBkv, sWo, sBo,
                   iWq, iBq, iWkv, iBkv, iWo, iBo,
                   ppW, ppB,
                   t1W, t1B, t2W, t2B, t3W, t3B,
                   part_ref, g_ref, *, cp):
    """Segmenter attention + process_part + topo_g + query encoder +
    interpolate attention + part-logit einsum, all fused."""
    b_sz = qpts_ref.shape[0]
    # Segmenter queries come from the constant z_pi embedding -> compute once.
    q_seg = _mm(zpi_ref[...], sWq[...]) + sBq[...]                   # (P, CP)
    for b in range(b_sz):
        z = z_ref[b]                                                 # (G, CP)

        # ---- part branch: segmenter attn -> process_part('fc') -> topo_g ----
        z_p = _attend_q(q_seg, z, sWkv, sBkv, sWo, sBo, cp)          # (P, CP)
        z_p = _mm(z_p, ppW[...]) + ppB[...]
        g = jnp.maximum(_mm(z_p, t1W[...]) + t1B[...], 0.0)
        g = jnp.maximum(_mm(g, t2W[...]) + t2B[...], 0.0)
        g_ref[b] = (_mm(g, t3W[...]) + t3B[...]).astype(g_ref.dtype)  # (P, ng+1)

        # ---- query branch: point MLP -> interpolate attention ----
        z_q = _point_mlp(qpts_ref[b], ew1, eb1, ew2, eb2)            # (Nq, CP)
        q_i = _mm(z_q, iWq[...]) + iBq[...]
        z_q_int = _attend_q(q_i, z, iWkv, iBkv, iWo, iBo, cp)        # (Nq, CP)

        # ---- part logits: einsum('bcp,bqc->bqp') == z_q_int @ z_p.T ----
        part_ref[b] = _mm_t(z_q_int, z_p).astype(part_ref.dtype)     # (Nq, P)


# ----------------------------------------------------------------------------
# Wrappers (pallas_call construction) — no grid: whole batch in one VMEM block
# ----------------------------------------------------------------------------

def _attn_args(p):
    return (p["wq"], p["bq"], p["wkv"], p["bkv"], p["wo"], p["bo"])


def predict_step(params, ee, z_cur):
    """Fused encode(ee) (+ pair concat) + condition(z_cur, context=z_e).

    Returns the lane-padded next latent, shape (B, L, CP)."""
    if ee.ndim == 3:
        ee4 = ee[:, None]                      # (B, 1, N, 3)
    else:                                      # (2, B, N, 3): [observed, target]
        ee4 = jnp.swapaxes(ee, 0, 1)           # (B, 2, N, 3)
    b = ee4.shape[0]
    cp = params["cp"]
    l = z_cur.shape[1]
    zcur_p = jnp.pad(z_cur, ((0, 0), (0, 0), (0, cp - z_cur.shape[-1])))
    enc = params["encoder"]
    args = (ee4, zcur_p, params["z_phi"],
            enc["w1"], enc["b1"], enc["w2"], enc["b2"],
            *_attn_args(params["aggregate"]),
            *_attn_args(params["condition"]))
    # Single kernel invocation (no grid): launch/DMA overhead dominates at
    # these sizes on single-TC v5e/v6e.
    # TODO(synk): on v7x, add a batch grid axis with pltpu.CORE_PARALLEL.
    return pl.pallas_call(
        functools.partial(_predict_kernel, cp=cp),
        out_shape=jax.ShapeDtypeStruct((b, l, cp), jnp.float32),
    )(*args)


def decode(params, query, z_pad):
    """Reconstructor.decode on the lane-padded latent z_pad (B, G, CP)."""
    b, nq, _ = query.shape
    cp = params["cp"]
    npart = params["z_pi"].shape[0]
    ng1 = params["ng1"]
    enc, pp, tg = params["encoder"], params["process_part"], params["topo_g"]
    args = (query, z_pad, params["z_pi"],
            enc["w1"], enc["b1"], enc["w2"], enc["b2"],
            *_attn_args(params["segmenter"]),
            *_attn_args(params["interpolate"]),
            pp["w"], pp["b"],
            tg["w1"], tg["b1"], tg["w2"], tg["b2"], tg["w3"], tg["b3"])
    return pl.pallas_call(
        functools.partial(_decode_kernel, cp=cp),
        out_shape=(jax.ShapeDtypeStruct((b, nq, npart), jnp.float32),
                   jax.ShapeDtypeStruct((b, npart, ng1), jnp.float32)),
    )(*args)


def predictor_forward(params, ee, query, z_cur, decode_flag=False):
    """Predictor.forward(ee, query, z_cur, decode=decode_flag)."""
    z_nxt_pad = predict_step(params, ee, z_cur)            # (B, L, CP)
    z_nxt = z_nxt_pad[..., :params["dim"]]                 # logical latent width
    if decode_flag:
        pred, g = decode(params, query, z_nxt_pad)         # consume padded z
    else:
        pred, g = None, None
    return pred, g, z_nxt


# ----------------------------------------------------------------------------
# Parameter init (mirrors _init_weights: trunc_normal(0.02), bias=0).
# Weights are bf16 for the MXU, biases f32; everything whose input or output is
# the latent dim is lane-padded to CP=round_up(latent,128) columns with zeros
# (padded activation columns are exactly zero through the whole network).
# ----------------------------------------------------------------------------

def trunc_normal(key, shape, std=0.02):
    return std * jax.random.truncated_normal(key, -2.0, 2.0, shape, jnp.float32)


def _pad2(w, rows, cols):
    return jnp.pad(w, ((0, rows - w.shape[0]), (0, cols - w.shape[1])))


def init_attn(key, dim, cp, scale):
    """Single-head cross-attention block: Wq separate (projects x), K/V fused
    (project context) into one (cp, 2cp) matrix; 1/sqrt(dim) folded into Wq
    (bias is zero at init, so it is unaffected)."""
    kq, kk, kv, ko = jax.random.split(key, 4)
    wq = _pad2(trunc_normal(kq, (dim, dim)) * scale, cp, cp)
    wk = _pad2(trunc_normal(kk, (dim, dim)), cp, cp)
    wv = _pad2(trunc_normal(kv, (dim, dim)), cp, cp)
    wo = _pad2(trunc_normal(ko, (dim, dim)), cp, cp)
    return {"wq": wq.astype(jnp.bfloat16),
            "bq": jnp.zeros((1, cp), jnp.float32),
            "wkv": jnp.concatenate([wk, wv], axis=1).astype(jnp.bfloat16),
            "bkv": jnp.zeros((1, 2 * cp), jnp.float32),
            "wo": wo.astype(jnp.bfloat16),
            "bo": jnp.zeros((1, cp), jnp.float32)}


def init_params(key, latent_dim, num_query_in, num_parts, num_genus, in_dim=3):
    cp = _round_up(latent_dim, LANE)
    scale = 1.0 / float(latent_dim) ** 0.5
    ng1 = num_genus + 1
    h1, h2 = latent_dim // 4, latent_dim // 16
    ks = jax.random.split(key, 12)
    enc_w1 = _pad2(trunc_normal(ks[0], (in_dim, latent_dim)), in_dim, cp)
    enc_w2 = _pad2(trunc_normal(ks[1], (latent_dim, latent_dim)), cp, cp)
    pp_w = _pad2(trunc_normal(ks[7], (latent_dim, latent_dim)), cp, cp)
    tg_w1 = _pad2(trunc_normal(ks[8], (latent_dim, h1)), cp, h1)
    tg_w2 = trunc_normal(ks[9], (h1, h2))
    tg_w3 = trunc_normal(ks[10], (h2, ng1))
    return {
        "dim": latent_dim, "cp": cp, "ng1": ng1,
        "encoder": {"w1": enc_w1.astype(jnp.bfloat16),
                    "b1": jnp.zeros((1, cp), jnp.float32),
                    "w2": enc_w2.astype(jnp.bfloat16),
                    "b2": jnp.zeros((1, cp), jnp.float32)},
        # nn.Embedding default init ~ N(0,1); lane-padded with zero columns.
        "z_phi": _pad2(jax.random.normal(ks[2], (num_query_in, latent_dim),
                                         jnp.float32), num_query_in, cp),
        "z_pi": _pad2(jax.random.normal(ks[3], (num_parts, latent_dim),
                                        jnp.float32), num_parts, cp),
        "aggregate": init_attn(ks[4], latent_dim, cp, scale),
        "segmenter": init_attn(ks[5], latent_dim, cp, scale),
        "interpolate": init_attn(ks[6], latent_dim, cp, scale),
        "condition": init_attn(ks[11], latent_dim, cp, scale),
        "process_part": {"w": pp_w.astype(jnp.bfloat16),
                         "b": jnp.zeros((1, cp), jnp.float32)},
        "topo_g": {"w1": tg_w1.astype(jnp.bfloat16),
                   "b1": jnp.zeros((1, h1), jnp.float32),
                   "w2": tg_w2.astype(jnp.bfloat16),
                   "b2": jnp.zeros((1, h2), jnp.float32),
                   "w3": tg_w3.astype(jnp.bfloat16),
                   "b3": jnp.zeros((1, ng1), jnp.float32)},
    }


# ----------------------------------------------------------------------------
# Demo
# ----------------------------------------------------------------------------

if __name__ == "__main__":
    B = 2
    LATENT = 32
    NUM_QUERY_IN = 8          # -> 9 latent tokens after the 'mean' high-level token
    NUM_PARTS = 4
    NUM_GENUS = 3
    N_OBS = 16
    N_QUERY = 16

    root = jax.random.PRNGKey(0)
    kp, ke, kq, kz = jax.random.split(root, 4)

    params = init_params(kp, LATENT, NUM_QUERY_IN, NUM_PARTS, NUM_GENUS)

    ee = jax.random.normal(ke, (B, N_OBS, 3), jnp.float32)           # observed points
    query = jax.random.normal(kq, (B, N_QUERY, 3), jnp.float32)      # query points
    z_cur = jax.random.normal(kz, (B, NUM_QUERY_IN + 1, LATENT), jnp.float32)

    # default path (decode=False): fused encode(ee)+condition -> one pallas_call
    pred0, g0, z_nxt0 = predictor_forward(params, ee, query, z_cur, decode_flag=False)
    z_nxt0 = jax.block_until_ready(z_nxt0)
    assert pred0 is None and g0 is None
    assert z_nxt0.shape == (B, NUM_QUERY_IN + 1, LATENT)

    # full path (decode=True): exercises the fused decode kernel too.
    pred, g, z_nxt = predictor_forward(params, ee, query, z_cur, decode_flag=True)
    pred = jax.block_until_ready(pred)
    g = jax.block_until_ready(g)
    z_nxt = jax.block_until_ready(z_nxt)
    assert pred.shape == (B, N_QUERY, NUM_PARTS)
    assert g.shape == (B, NUM_PARTS, NUM_GENUS + 1)
    assert z_nxt.shape == (B, NUM_QUERY_IN + 1, LATENT)
    assert jnp.all(jnp.isfinite(pred)) and jnp.all(jnp.isfinite(g))
    assert jnp.all(jnp.isfinite(z_nxt))

    # pair path (ee.shape == (2, B, N, 3)): both clouds encoded + concatenated
    # inside the SAME single fused kernel call.
    ee_pair = jnp.stack([ee, -ee], axis=0)
    _, _, z_nxt_pair = predictor_forward(params, ee_pair, query, z_cur, decode_flag=False)
    z_nxt_pair = jax.block_until_ready(z_nxt_pair)
    assert z_nxt_pair.shape == (B, NUM_QUERY_IN + 1, LATENT)
    assert jnp.all(jnp.isfinite(z_nxt_pair))

    print("KERNEL_OK")
</pallas_src>

<mosaic_0001>
module attributes {stable_mosaic.version = 11 : i64} {
  func.func @_predict_kernel(%arg0: memref<2x1x16x3xf32, #tpu.memory_space<vmem>>, %arg1: memref<2x9x128xf32, #tpu.memory_space<vmem>>, %arg2: memref<8x128xf32, #tpu.memory_space<vmem>>, %arg3: memref<3x128xbf16, #tpu.memory_space<vmem>>, %arg4: memref<1x128xf32, #tpu.memory_space<vmem>>, %arg5: memref<128x128xbf16, #tpu.memory_space<vmem>>, %arg6: memref<1x128xf32, #tpu.memory_space<vmem>>, %arg7: memref<128x128xbf16, #tpu.memory_space<vmem>>, %arg8: memref<1x128xf32, #tpu.memory_space<vmem>>, %arg9: memref<128x256xbf16, #tpu.memory_space<vmem>>, %arg10: memref<1x256xf32, #tpu.memory_space<vmem>>, %arg11: memref<128x128xbf16, #tpu.memory_space<vmem>>, %arg12: memref<1x128xf32, #tpu.memory_space<vmem>>, %arg13: memref<128x128xbf16, #tpu.memory_space<vmem>>, %arg14: memref<1x128xf32, #tpu.memory_space<vmem>>, %arg15: memref<128x256xbf16, #tpu.memory_space<vmem>>, %arg16: memref<1x256xf32, #tpu.memory_space<vmem>>, %arg17: memref<128x128xbf16, #tpu.memory_space<vmem>>, %arg18: memref<1x128xf32, #tpu.memory_space<vmem>>, %arg19: memref<2x9x128xf32, #tpu.memory_space<vmem>>) attributes {dimension_semantics = [], scalar_prefetch = 0 : i64, scratch_operands = 0 : i64, tpu.core_type = #tpu.core_type<tc>} {
    %c0 = arith.constant 0 : index
    %c0_0 = arith.constant 0 : index
    %0 = vector.load %arg2[%c0, %c0_0] : memref<8x128xf32, #tpu.memory_space<vmem>>, vector<8x128xf32>
    %c0_1 = arith.constant 0 : index
    %c0_2 = arith.constant 0 : index
    %1 = vector.load %arg7[%c0_1, %c0_2] : memref<128x128xbf16, #tpu.memory_space<vmem>>, vector<128x128xbf16>
    %2 = arith.truncf %0 : vector<8x128xf32> to vector<8x128xbf16>
    %cst = arith.constant dense<0.000000e+00> : vector<8x128xf32>
    %3 = tpu.matmul %2, %1, %cst {dimension_numbers = #tpu.dot_dimension_numbers<[1], [0], [0], [1], [0, 0, 1, 1], [], []>} : vector<8x128xbf16>, vector<128x128xbf16>, vector<8x128xf32> -> vector<8x128xf32>
    %c0_3 = arith.constant 0 : index
    %c0_4 = arith.constant 0 : index
    %4 = vector.load %arg8[%c0_3, %c0_4] : memref<1x128xf32, #tpu.memory_space<vmem>>, vector<1x128xf32>
    %5 = vector.broadcast %4 : vector<1x128xf32> to vector<8x128xf32>
    %6 = arith.addf %3, %5 : vector<8x128xf32>
    %c0_5 = arith.constant 0 : index
    %c0_6 = arith.constant 0 : index
    %c0_7 = arith.constant 0 : index
    %c0_8 = arith.constant 0 : index
    %7 = vector.load %arg0[%c0_5, %c0_6, %c0_7, %c0_8] : memref<2x1x16x3xf32, #tpu.memory_space<vmem>>, vector<1x1x16x3xf32>
    %8 = vector.shape_cast %7 : vector<1x1x16x3xf32> to vector<16x3xf32>
    %c0_9 = arith.constant 0 : index
    %c0_10 = arith.constant 0 : index
    %9 = vector.load %arg3[%c0_9, %c0_10] : memref<3x128xbf16, #tpu.memory_space<vmem>>, vector<3x128xbf16>
    %10 = arith.truncf %8 : vector<16x3xf32> to vector<16x3xbf16>
    %cst_11 = arith.constant dense<0.000000e+00> : vector<16x128xf32>
    %11 = tpu.matmul %10, %9, %cst_11 {dimension_numbers = #tpu.dot_dimension_numbers<[1], [0], [0], [1], [0, 0, 1, 1], [], []>} : vector<16x3xbf16>, vector<3x128xbf16>, vector<16x128xf32> -> vector<16x128xf32>
    %c0_12 = arith.constant 0 : index
    %c0_13 = arith.constant 0 : index
    %12 = vector.load %arg4[%c0_12, %c0_13] : memref<1x128xf32, #tpu.memory_space<vmem>>, vector<1x128xf32>
    %13 = vector.broadcast %12 : vector<1x128xf32> to vector<16x128xf32>
    %14 = arith.addf %11, %13 : vector<16x128xf32>
    %cst_14 = arith.constant 0.000000e+00 : f32
    %15 = vector.broadcast %cst_14 : f32 to vector<16x128xf32>
    %16 = arith.maximumf %14, %15 : vector<16x128xf32>
    %c0_15 = arith.constant 0 : index
    %c0_16 = arith.constant 0 : index
    %17 = vector.load %arg5[%c0_15, %c0_16] : memref<128x128xbf16, #tpu.memory_space<vmem>>, vector<128x128xbf16>
    %18 = arith.truncf %16 : vector<16x128xf32> to vector<16x128xbf16>
    %cst_17 = arith.constant dense<0.000000e+00> : vector<16x128xf32>
    %19 = tpu.matmul %18, %17, %cst_17 {dimension_numbers = #tpu.dot_dimension_numbers<[1], [0], [0], [1], [0, 0, 1, 1], [], []>} : vector<16x128xbf16>, vector<128x128xbf16>, vector<16x128xf32> -> vector<16x128xf32>
    %c0_18 = arith.constant 0 : index
    %c0_19 = arith.constant 0 : index
    %20 = vector.load %arg6[%c0_18, %c0_19] : memref<1x128xf32, #tpu.memory_space<vmem>>, vector<1x128xf32>
    %21 = vector.broadcast %20 : vector<1x128xf32> to vector<16x128xf32>
    %22 = arith.addf %19, %21 : vector<16x128xf32>
    %c0_20 = arith.constant 0 : index
    %c0_21 = arith.constant 0 : index
    %23 = vector.load %arg9[%c0_20, %c0_21] : memref<128x256xbf16, #tpu.memory_space<vmem>>, vector<128x256xbf16>
    %24 = arith.truncf %22 : vector<16x128xf32> to vector<16x128xbf16>
    %cst_22 = arith.constant dense<0.000000e+00> : vector<16x256xf32>
    %25 = tpu.matmul %24, %23, %cst_22 {dimension_numbers = #tpu.dot_dimension_numbers<[1], [0], [0], [1], [0, 0, 1, 1], [], []>} : vector<16x128xbf16>, vector<128x256xbf16>, vector<16x256xf32> -> vector<16x256xf32>
    %c0_23 = arith.constant 0 : index
    %c0_24 = arith.constant 0 : index
    %26 = vector.load %arg10[%c0_23, %c0_24] : memref<1x256xf32, #tpu.memory_space<vmem>>, vector<1x256xf32>
    %27 = vector.broadcast %26 : vector<1x256xf32> to vector<16x256xf32>
    %28 = arith.addf %25, %27 : vector<16x256xf32>
    %29 = vector.extract_strided_slice %28 {offsets = [0, 0], sizes = [16, 128], strides = [1, 1]} : vector<16x256xf32> to vector<16x128xf32>
    %30 = vector.extract_strided_slice %28 {offsets = [0, 128], sizes = [16, 128], strides = [1, 1]} : vector<16x256xf32> to vector<16x128xf32>
    %31 = arith.truncf %6 : vector<8x128xf32> to vector<8x128xbf16>
    %32 = arith.truncf %29 : vector<16x128xf32> to vector<16x128xbf16>
    %cst_25 = arith.constant dense<0.000000e+00> : vector<8x16xf32>
    %33 = tpu.matmul %31, %32, %cst_25 {dimension_numbers = #tpu.dot_dimension_numbers<[1], [1], [0], [0], [0, 0, 1, 0], [], []>} : vector<8x128xbf16>, vector<16x128xbf16>, vector<8x16xf32> -> vector<8x16xf32>
    %cst_26 = arith.constant dense<0xFF800000> : vector<8xf32>
    %34 = vector.multi_reduction <maximumf>, %33, %cst_26 [1] : vector<8x16xf32> to vector<8xf32>
    %35 = vector.shape_cast %34 : vector<8xf32> to vector<8x1xf32>
    %36 = vector.broadcast %35 : vector<8x1xf32> to vector<8x16xf32>
    %37 = arith.subf %33, %36 : vector<8x16xf32>
    %38 = math.exp %37 : vector<8x16xf32>
    %cst_27 = arith.constant dense<0.000000e+00> : vector<8xf32>
    %39 = vector.multi_reduction <add>, %38, %cst_27 [1] : vector<8x16xf32> to vector<8xf32>
    %40 = vector.shape_cast %39 : vector<8xf32> to vector<8x1xf32>
    %41 = tpu.reciprocal %40 {approx = true} : vector<8x1xf32> -> vector<8x1xf32>
    %42 = vector.broadcast %41 : vector<8x1xf32> to vector<8x16xf32>
    %43 = arith.mulf %38, %42 : vector<8x16xf32>
    %44 = arith.truncf %43 : vector<8x16xf32> to vector<8x16xbf16>
    %45 = arith.truncf %30 : vector<16x128xf32> to vector<16x128xbf16>
    %cst_28 = arith.constant dense<0.000000e+00> : vector<8x128xf32>
    %46 = tpu.matmul %44, %45, %cst_28 {dimension_numbers = #tpu.dot_dimension_numbers<[1], [0], [0], [1], [0, 0, 1, 1], [], []>} : vector<8x16xbf16>, vector<16x128xbf16>, vector<8x128xf32> -> vector<8x128xf32>
    %c0_29 = arith.constant 0 : index
    %c0_30 = arith.constant 0 : index
    %47 = vector.load %arg11[%c0_29, %c0_30] : memref<128x128xbf16, #tpu.memory_space<vmem>>, vector<128x128xbf16>
    %48 = arith.truncf %46 : vector<8x128xf32> to vector<8x128xbf16>
    %cst_31 = arith.constant dense<0.000000e+00> : vector<8x128xf32>
    %49 = tpu.matmul %48, %47, %cst_31 {dimension_numbers = #tpu.dot_dimension_numbers<[1], [0], [0], [1], [0, 0, 1, 1], [], []>} : vector<8x128xbf16>, vector<128x128xbf16>, vector<8x128xf32> -> vector<8x128xf32>
    %c0_32 = arith.constant 0 : index
    %c0_33 = arith.constant 0 : index
    %50 = vector.load %arg12[%c0_32, %c0_33] : memref<1x128xf32, #tpu.memory_space<vmem>>, vector<1x128xf32>
    %51 = vector.broadcast %50 : vector<1x128xf32> to vector<8x128xf32>
    %52 = arith.addf %49, %51 : vector<8x128xf32>
    %cst_34 = arith.constant dense<0.000000e+00> : vector<128xf32>
    %53 = vector.multi_reduction <add>, %52, %cst_34 [0] : vector<8x128xf32> to vector<128xf32>
    %54 = vector.shape_cast %53 : vector<128xf32> to vector<1x128xf32>
    %cst_35 = arith.constant 8.000000e+00 : f32
    %55 = vector.broadcast %cst_35 : f32 to vector<1x128xf32>
    %56 = arith.divf %54, %55 : vector<1x128xf32>
    %57 = tpu.concatenate %52, %56 in 0 : vector<8x128xf32>, vector<1x128xf32> -> vector<9x128xf32>
    %c0_36 = arith.constant 0 : index
    %c0_37 = arith.constant 0 : index
    %c0_38 = arith.constant 0 : index
    %58 = vector.load %arg1[%c0_36, %c0_37, %c0_38] : memref<2x9x128xf32, #tpu.memory_space<vmem>>, vector<1x9x128xf32>
    %59 = vector.shape_cast %58 : vector<1x9x128xf32> to vector<9x128xf32>
    %c0_39 = arith.constant 0 : index
    %c0_40 = arith.constant 0 : index
    %60 = vector.load %arg13[%c0_39, %c0_40] : memref<128x128xbf16, #tpu.memory_space<vmem>>, vector<128x128xbf16>
    %61 = arith.truncf %59 : vector<9x128xf32> to vector<9x128xbf16>
    %cst_41 = arith.constant dense<0.000000e+00> : vector<9x128xf32>
    %62 = tpu.matmul %61, %60, %cst_41 {dimension_numbers = #tpu.dot_dimension_numbers<[1], [0], [0], [1], [0, 0, 1, 1], [], []>} : vector<9x128xbf16>, vector<128x128xbf16>, vector<9x128xf32> -> vector<9x128xf32>
    %c0_42 = arith.constant 0 : index
    %c0_43 = arith.constant 0 : index
    %63 = vector.load %arg14[%c0_42, %c0_43] : memref<1x128xf32, #tpu.memory_space<vmem>>, vector<1x128xf32>
    %64 = vector.broadcast %63 : vector<1x128xf32> to vector<9x128xf32>
    %65 = arith.addf %62, %64 : vector<9x128xf32>
    %c0_44 = arith.constant 0 : index
    %c0_45 = arith.constant 0 : index
    %66 = vector.load %arg15[%c0_44, %c0_45] : memref<128x256xbf16, #tpu.memory_space<vmem>>, vector<128x256xbf16>
    %67 = arith.truncf %57 : vector<9x128xf32> to vector<9x128xbf16>
    %cst_46 = arith.constant dense<0.000000e+00> : vector<9x256xf32>
    %68 = tpu.matmul %67, %66, %cst_46 {dimension_numbers = #tpu.dot_dimension_numbers<[1], [0], [0], [1], [0, 0, 1, 1], [], []>} : vector<9x128xbf16>, vector<128x256xbf16>, vector<9x256xf32> -> vector<9x256xf32>
    %c0_47 = arith.constant 0 : index
    %c0_48 = arith.constant 0 : index
    %69 = vector.load %arg16[%c0_47, %c0_48] : memref<1x256xf32, #tpu.memory_space<vmem>>, vector<1x256xf32>
    %70 = vector.broadcast %69 : vector<1x256xf32> to vector<9x256xf32>
    %71 = arith.addf %68, %70 : vector<9x256xf32>
    %72 = vector.extract_strided_slice %71 {offsets = [0, 0], sizes = [9, 128], strides = [1, 1]} : vector<9x256xf32> to vector<9x128xf32>
    %73 = vector.extract_strided_slice %71 {offsets = [0, 128], sizes = [9, 128], strides = [1, 1]} : vector<9x256xf32> to vector<9x128xf32>
    %74 = arith.truncf %65 : vector<9x128xf32> to vector<9x128xbf16>
    %75 = arith.truncf %72 : vector<9x128xf32> to vector<9x128xbf16>
    %cst_49 = arith.constant dense<0.000000e+00> : vector<9x9xf32>
    %76 = tpu.matmul %74, %75, %cst_49 {dimension_numbers = #tpu.dot_dimension_numbers<[1], [1], [0], [0], [0, 0, 1, 0], [], []>} : vector<9x128xbf16>, vector<9x128xbf16>, vector<9x9xf32> -> vector<9x9xf32>
    %cst_50 = arith.constant dense<0xFF800000> : vector<9xf32>
    %77 = vector.multi_reduction <maximumf>, %76, %cst_50 [1] : vector<9x9xf32> to vector<9xf32>
    %78 = vector.shape_cast %77 : vector<9xf32> to vector<9x1xf32>
    %79 = vector.broadcast %78 : vector<9x1xf32> to vector<9x9xf32>
    %80 = arith.subf %76, %79 : vector<9x9xf32>
    %81 = math.exp %80 : vector<9x9xf32>
    %cst_51 = arith.constant dense<0.000000e+00> : vector<9xf32>
    %82 = vector.multi_reduction <add>, %81, %cst_51 [1] : vector<9x9xf32> to vector<9xf32>
    %83 = vector.shape_cast %82 : vector<9xf32> to vector<9x1xf32>
    %84 = tpu.reciprocal %83 {approx = true} : vector<9x1xf32> -> vector<9x1xf32>
    %85 = vector.broadcast %84 : vector<9x1xf32> to vector<9x9xf32>
    %86 = arith.mulf %81, %85 : vector<9x9xf32>
    %87 = arith.truncf %86 : vector<9x9xf32> to vector<9x9xbf16>
    %88 = arith.truncf %73 : vector<9x128xf32> to vector<9x128xbf16>
    %cst_52 = arith.constant dense<0.000000e+00> : vector<9x128xf32>
    %89 = tpu.matmul %87, %88, %cst_52 {dimension_numbers = #tpu.dot_dimension_numbers<[1], [0], [0], [1], [0, 0, 1, 1], [], []>} : vector<9x9xbf16>, vector<9x128xbf16>, vector<9x128xf32> -> vector<9x128xf32>
    %c0_53 = arith.constant 0 : index
    %c0_54 = arith.constant 0 : index
    %90 = vector.load %arg17[%c0_53, %c0_54] : memref<128x128xbf16, #tpu.memory_space<vmem>>, vector<128x128xbf16>
    %91 = arith.truncf %89 : vector<9x128xf32> to vector<9x128xbf16>
    %cst_55 = arith.constant dense<0.000000e+00> : vector<9x128xf32>
    %92 = tpu.matmul %91, %90, %cst_55 {dimension_numbers = #tpu.dot_dimension_numbers<[1], [0], [0], [1], [0, 0, 1, 1], [], []>} : vector<9x128xbf16>, vector<128x128xbf16>, vector<9x128xf32> -> vector<9x128xf32>
    %c0_56 = arith.constant 0 : index
    %c0_57 = arith.constant 0 : index
    %93 = vector.load %arg18[%c0_56, %c0_57] : memref<1x128xf32, #tpu.memory_space<vmem>>, vector<1x128xf32>
    %94 = vector.broadcast %93 : vector<1x128xf32> to vector<9x128xf32>
    %95 = arith.addf %92, %94 : vector<9x128xf32>
    %c0_58 = arith.constant 0 : index
    %c0_59 = arith.constant 0 : index
    %c0_60 = arith.constant 0 : index
    %96 = vector.load %arg19[%c0_58, %c0_59, %c0_60] : memref<2x9x128xf32, #tpu.memory_space<vmem>>, vector<1x9x128xf32>
    %97 = vector.shape_cast %96 : vector<1x9x128xf32> to vector<9x128xf32>
    %98 = vector.shape_cast %95 : vector<9x128xf32> to vector<1x9x128xf32>
    tpu.vector_store %arg19[%c0_58, %c0_59, %c0_60], %98 {strides = array<i32>} : memref<2x9x128xf32, #tpu.memory_space<vmem>>, vector<1x9x128xf32>,
    %c1 = arith.constant 1 : index
    %c0_61 = arith.constant 0 : index
    %c0_62 = arith.constant 0 : index
    %c0_63 = arith.constant 0 : index
    %99 = vector.load %arg0[%c1, %c0_61, %c0_62, %c0_63] : memref<2x1x16x3xf32, #tpu.memory_space<vmem>>, vector<1x1x16x3xf32>
    %100 = vector.shape_cast %99 : vector<1x1x16x3xf32> to vector<16x3xf32>
    %c0_64 = arith.constant 0 : index
    %c0_65 = arith.constant 0 : index
    %101 = vector.load %arg3[%c0_64, %c0_65] : memref<3x128xbf16, #tpu.memory_space<vmem>>, vector<3x128xbf16>
    %102 = arith.truncf %100 : vector<16x3xf32> to vector<16x3xbf16>
    %cst_66 = arith.constant dense<0.000000e+00> : vector<16x128xf32>
    %103 = tpu.matmul %102, %101, %cst_66 {dimension_numbers = #tpu.dot_dimension_numbers<[1], [0], [0], [1], [0, 0, 1, 1], [], []>} : vector<16x3xbf16>, vector<3x128xbf16>, vector<16x128xf32> -> vector<16x128xf32>
    %c0_67 = arith.constant 0 : index
    %c0_68 = arith.constant 0 : index
    %104 = vector.load %arg4[%c0_67, %c0_68] : memref<1x128xf32, #tpu.memory_space<vmem>>, vector<1x128xf32>
    %105 = vector.broadcast %104 : vector<1x128xf32> to vector<16x128xf32>
    %106 = arith.addf %103, %105 : vector<16x128xf32>
    %cst_69 = arith.constant 0.000000e+00 : f32
    %107 = vector.broadcast %cst_69 : f32 to vector<16x128xf32>
    %108 = arith.maximumf %106, %107 : vector<16x128xf32>
    %c0_70 = arith.constant 0 : index
    %c0_71 = arith.constant 0 : index
    %109 = vector.load %arg5[%c0_70, %c0_71] : memref<128x128xbf16, #tpu.memory_space<vmem>>, vector<128x128xbf16>
    %110 = arith.truncf %108 : vector<16x128xf32> to vector<16x128xbf16>
    %cst_72 = arith.constant dense<0.000000e+00> : vector<16x128xf32>
    %111 = tpu.matmul %110, %109, %cst_72 {dimension_numbers = #tpu.dot_dimension_numbers<[1], [0], [0], [1], [0, 0, 1, 1], [], []>} : vector<16x128xbf16>, vector<128x128xbf16>, vector<16x128xf32> -> vector<16x128xf32>
    %c0_73 = arith.constant 0 : index
    %c0_74 = arith.constant 0 : index
    %112 = vector.load %arg6[%c0_73, %c0_74] : memref<1x128xf32, #tpu.memory_space<vmem>>, vector<1x128xf32>
    %113 = vector.broadcast %112 : vector<1x128xf32> to vector<16x128xf32>
    %114 = arith.addf %111, %113 : vector<16x128xf32>
    %c0_75 = arith.constant 0 : index
    %c0_76 = arith.constant 0 : index
    %115 = vector.load %arg9[%c0_75, %c0_76] : memref<128x256xbf16, #tpu.memory_space<vmem>>, vector<128x256xbf16>
    %116 = arith.truncf %114 : vector<16x128xf32> to vector<16x128xbf16>
    %cst_77 = arith.constant dense<0.000000e+00> : vector<16x256xf32>
    %117 = tpu.matmul %116, %115, %cst_77 {dimension_numbers = #tpu.dot_dimension_numbers<[1], [0], [0], [1], [0, 0, 1, 1], [], []>} : vector<16x128xbf16>, vector<128x256xbf16>, vector<16x256xf32> -> vector<16x256xf32>
    %c0_78 = arith.constant 0 : index
    %c0_79 = arith.constant 0 : index
    %118 = vector.load %arg10[%c0_78, %c0_79] : memref<1x256xf32, #tpu.memory_space<vmem>>, vector<1x256xf32>
    %119 = vector.broadcast %118 : vector<1x256xf32> to vector<16x256xf32>
    %120 = arith.addf %117, %119 : vector<16x256xf32>
    %121 = vector.extract_strided_slice %120 {offsets = [0, 0], sizes = [16, 128], strides = [1, 1]} : vector<16x256xf32> to vector<16x128xf32>
    %122 = vector.extract_strided_slice %120 {offsets = [0, 128], sizes = [16, 128], strides = [1, 1]} : vector<16x256xf32> to vector<16x128xf32>
    %123 = arith.truncf %6 : vector<8x128xf32> to vector<8x128xbf16>
    %124 = arith.truncf %121 : vector<16x128xf32> to vector<16x128xbf16>
    %cst_80 = arith.constant dense<0.000000e+00> : vector<8x16xf32>
    %125 = tpu.matmul %123, %124, %cst_80 {dimension_numbers = #tpu.dot_dimension_numbers<[1], [1], [0], [0], [0, 0, 1, 0], [], []>} : vector<8x128xbf16>, vector<16x128xbf16>, vector<8x16xf32> -> vector<8x16xf32>
    %cst_81 = arith.constant dense<0xFF800000> : vector<8xf32>
    %126 = vector.multi_reduction <maximumf>, %125, %cst_81 [1] : vector<8x16xf32> to vector<8xf32>
    %127 = vector.shape_cast %126 : vector<8xf32> to vector<8x1xf32>
    %128 = vector.broadcast %127 : vector<8x1xf32> to vector<8x16xf32>
    %129 = arith.subf %125, %128 : vector<8x16xf32>
    %130 = math.exp %129 : vector<8x16xf32>
    %cst_82 = arith.constant dense<0.000000e+00> : vector<8xf32>
    %131 = vector.multi_reduction <add>, %130, %cst_82 [1] : vector<8x16xf32> to vector<8xf32>
    %132 = vector.shape_cast %131 : vector<8xf32> to vector<8x1xf32>
    %133 = tpu.reciprocal %132 {approx = true} : vector<8x1xf32> -> vector<8x1xf32>
    %134 = vector.broadcast %133 : vector<8x1xf32> to vector<8x16xf32>
    %135 = arith.mulf %130, %134 : vector<8x16xf32>
    %136 = arith.truncf %135 : vector<8x16xf32> to vector<8x16xbf16>
    %137 = arith.truncf %122 : vector<16x128xf32> to vector<16x128xbf16>
    %cst_83 = arith.constant dense<0.000000e+00> : vector<8x128xf32>
    %138 = tpu.matmul %136, %137, %cst_83 {dimension_numbers = #tpu.dot_dimension_numbers<[1], [0], [0], [1], [0, 0, 1, 1], [], []>} : vector<8x16xbf16>, vector<16x128xbf16>, vector<8x128xf32> -> vector<8x128xf32>
    %c0_84 = arith.constant 0 : index
    %c0_85 = arith.constant 0 : index
    %139 = vector.load %arg11[%c0_84, %c0_85] : memref<128x128xbf16, #tpu.memory_space<vmem>>, vector<128x128xbf16>
    %140 = arith.truncf %138 : vector<8x128xf32> to vector<8x128xbf16>
    %cst_86 = arith.constant dense<0.000000e+00> : vector<8x128xf32>
    %141 = tpu.matmul %140, %139, %cst_86 {dimension_numbers = #tpu.dot_dimension_numbers<[1], [0], [0], [1], [0, 0, 1, 1], [], []>} : vector<8x128xbf16>, vector<128x128xbf16>, vector<8x128xf32> -> vector<8x128xf32>
    %c0_87 = arith.constant 0 : index
    %c0_88 = arith.constant 0 : index
    %142 = vector.load %arg12[%c0_87, %c0_88] : memref<1x128xf32, #tpu.memory_space<vmem>>, vector<1x128xf32>
    %143 = vector.broadcast %142 : vector<1x128xf32> to vector<8x128xf32>
    %144 = arith.addf %141, %143 : vector<8x128xf32>
    %cst_89 = arith.constant dense<0.000000e+00> : vector<128xf32>
    %145 = vector.multi_reduction <add>, %144, %cst_89 [0] : vector<8x128xf32> to vector<128xf32>
    %146 = vector.shape_cast %145 : vector<128xf32> to vector<1x128xf32>
    %cst_90 = arith.constant 8.000000e+00 : f32
    %147 = vector.broadcast %cst_90 : f32 to vector<1x128xf32>
    %148 = arith.divf %146, %147 : vector<1x128xf32>
    %149 = tpu.concatenate %144, %148 in 0 : vector<8x128xf32>, vector<1x128xf32> -> vector<9x128xf32>
    %c1_91 = arith.constant 1 : index
    %c0_92 = arith.constant 0 : index
    %c0_93 = arith.constant 0 : index
    %150 = vector.load %arg1[%c1_91, %c0_92, %c0_93] : memref<2x9x128xf32, #tpu.memory_space<vmem>>, vector<1x9x128xf32>
    %151 = vector.shape_cast %150 : vector<1x9x128xf32> to vector<9x128xf32>
    %c0_94 = arith.constant 0 : index
    %c0_95 = arith.constant 0 : index
    %152 = vector.load %arg13[%c0_94, %c0_95] : memref<128x128xbf16, #tpu.memory_space<vmem>>, vector<128x128xbf16>
    %153 = arith.truncf %151 : vector<9x128xf32> to vector<9x128xbf16>
    %cst_96 = arith.constant dense<0.000000e+00> : vector<9x128xf32>
    %154 = tpu.matmul %153, %152, %cst_96 {dimension_numbers = #tpu.dot_dimension_numbers<[1], [0], [0], [1], [0, 0, 1, 1], [], []>} : vector<9x128xbf16>, vector<128x128xbf16>, vector<9x128xf32> -> vector<9x128xf32>
    %c0_97 = arith.constant 0 : index
    %c0_98 = arith.constant 0 : index
    %155 = vector.load %arg14[%c0_97, %c0_98] : memref<1x128xf32, #tpu.memory_space<vmem>>, vector<1x128xf32>
    %156 = vector.broadcast %155 : vector<1x128xf32> to vector<9x128xf32>
    %157 = arith.addf %154, %156 : vector<9x128xf32>
    %c0_99 = arith.constant 0 : index
    %c0_100 = arith.constant 0 : index
    %158 = vector.load %arg15[%c0_99, %c0_100] : memref<128x256xbf16, #tpu.memory_space<vmem>>, vector<128x256xbf16>
    %159 = arith.truncf %149 : vector<9x128xf32> to vector<9x128xbf16>
    %cst_101 = arith.constant dense<0.000000e+00> : vector<9x256xf32>
    %160 = tpu.matmul %159, %158, %cst_101 {dimension_numbers = #tpu.dot_dimension_numbers<[1], [0], [0], [1], [0, 0, 1, 1], [], []>} : vector<9x128xbf16>, vector<128x256xbf16>, vector<9x256xf32> -> vector<9x256xf32>
    %c0_102 = arith.constant 0 : index
    %c0_103 = arith.constant 0 : index
    %161 = vector.load %arg16[%c0_102, %c0_103] : memref<1x256xf32, #tpu.memory_space<vmem>>, vector<1x256xf32>
    %162 = vector.broadcast %161 : vector<1x256xf32> to vector<9x256xf32>
    %163 = arith.addf %160, %162 : vector<9x256xf32>
    %164 = vector.extract_strided_slice %163 {offsets = [0, 0], sizes = [9, 128], strides = [1, 1]} : vector<9x256xf32> to vector<9x128xf32>
    %165 = vector.extract_strided_slice %163 {offsets = [0, 128], sizes = [9, 128], strides = [1, 1]} : vector<9x256xf32> to vector<9x128xf32>
    %166 = arith.truncf %157 : vector<9x128xf32> to vector<9x128xbf16>
    %167 = arith.truncf %164 : vector<9x128xf32> to vector<9x128xbf16>
    %cst_104 = arith.constant dense<0.000000e+00> : vector<9x9xf32>
    %168 = tpu.matmul %166, %167, %cst_104 {dimension_numbers = #tpu.dot_dimension_numbers<[1], [1], [0], [0], [0, 0, 1, 0], [], []>} : vector<9x128xbf16>, vector<9x128xbf16>, vector<9x9xf32> -> vector<9x9xf32>
    %cst_105 = arith.constant dense<0xFF800000> : vector<9xf32>
    %169 = vector.multi_reduction <maximumf>, %168, %cst_105 [1] : vector<9x9xf32> to vector<9xf32>
    %170 = vector.shape_cast %169 : vector<9xf32> to vector<9x1xf32>
    %171 = vector.broadcast %170 : vector<9x1xf32> to vector<9x9xf32>
    %172 = arith.subf %168, %171 : vector<9x9xf32>
    %173 = math.exp %172 : vector<9x9xf32>
    %cst_106 = arith.constant dense<0.000000e+00> : vector<9xf32>
    %174 = vector.multi_reduction <add>, %173, %cst_106 [1] : vector<9x9xf32> to vector<9xf32>
    %175 = vector.shape_cast %174 : vector<9xf32> to vector<9x1xf32>
    %176 = tpu.reciprocal %175 {approx = true} : vector<9x1xf32> -> vector<9x1xf32>
    %177 = vector.broadcast %176 : vector<9x1xf32> to vector<9x9xf32>
    %178 = arith.mulf %173, %177 : vector<9x9xf32>
    %179 = arith.truncf %178 : vector<9x9xf32> to vector<9x9xbf16>
    %180 = arith.truncf %165 : vector<9x128xf32> to vector<9x128xbf16>
    %cst_107 = arith.constant dense<0.000000e+00> : vector<9x128xf32>
    %181 = tpu.matmul %179, %180, %cst_107 {dimension_numbers = #tpu.dot_dimension_numbers<[1], [0], [0], [1], [0, 0, 1, 1], [], []>} : vector<9x9xbf16>, vector<9x128xbf16>, vector<9x128xf32> -> vector<9x128xf32>
    %c0_108 = arith.constant 0 : index
    %c0_109 = arith.constant 0 : index
    %182 = vector.load %arg17[%c0_108, %c0_109] : memref<128x128xbf16, #tpu.memory_space<vmem>>, vector<128x128xbf16>
    %183 = arith.truncf %181 : vector<9x128xf32> to vector<9x128xbf16>
    %cst_110 = arith.constant dense<0.000000e+00> : vector<9x128xf32>
    %184 = tpu.matmul %183, %182, %cst_110 {dimension_numbers = #tpu.dot_dimension_numbers<[1], [0], [0], [1], [0, 0, 1, 1], [], []>} : vector<9x128xbf16>, vector<128x128xbf16>, vector<9x128xf32> -> vector<9x128xf32>
    %c0_111 = arith.constant 0 : index
    %c0_112 = arith.constant 0 : index
    %185 = vector.load %arg18[%c0_111, %c0_112] : memref<1x128xf32, #tpu.memory_space<vmem>>, vector<1x128xf32>
    %186 = vector.broadcast %185 : vector<1x128xf32> to vector<9x128xf32>
    %187 = arith.addf %184, %186 : vector<9x128xf32>
    %c1_113 = arith.constant 1 : index
    %c0_114 = arith.constant 0 : index
    %c0_115 = arith.constant 0 : index
    %188 = vector.load %arg19[%c1_113, %c0_114, %c0_115] : memref<2x9x128xf32, #tpu.memory_space<vmem>>, vector<1x9x128xf32>
    %189 = vector.shape_cast %188 : vector<1x9x128xf32> to vector<9x128xf32>
    %190 = vector.shape_cast %187 : vector<9x128xf32> to vector<1x9x128xf32>
    tpu.vector_store %arg19[%c1_113, %c0_114, %c0_115], %190 {strides = array<i32>} : memref<2x9x128xf32, #tpu.memory_space<vmem>>, vector<1x9x128xf32>,
    return
  }
}

</mosaic_0001>

<bundles_post_ra>
// kernel: tpu_custom_call.1
= control target key start
LH: loop header
LB: loop body
LE: loop exit
PB: predicated region body
PF: predicated region fallthrough
CT: control target
= control target key end

     0   :  { %s3953_s0 = inlined_call_operand.vmem [shape: f32[2,1,16,3], index: 0, kind: input, shape index: {}]   ;;  %s3954_s1 = inlined_call_operand.vmem [shape: f32[2,9,128], index: 1, kind: input, shape index: {}]   ;;  %s3955_s2 = inlined_call_operand.vmem [shape: f32[8,128], index: 2, kind: input, shape index: {}]   ;;  %s3956_s3 = inlined_call_operand.vmem [shape: bf16[3,128], index: 3, kind: input, shape index: {}]   ;;  %s3957_s4 = inlined_call_operand.vmem [shape: f32[1,128], index: 4, kind: input, shape index: {}]   ;;  %s3958_s5 = inlined_call_operand.hbm [shape: bf16[128,128], index: 5, kind: input, shape index: {}]   ;;  %s3959_s6 = inlined_call_operand.vmem [shape: f32[1,128], index: 6, kind: input, shape index: {}]   ;;  %s3960_s7 = inlined_call_operand.hbm [shape: bf16[128,128], index: 7, kind: input, shape index: {}]   ;;  %s3961_s8 = inlined_call_operand.hbm [shape: f32[1,128], index: 8, kind: input, shape index: {}]   ;;  %s3962_s9 = inlined_call_operand.hbm [shape: bf16[128,256], index: 9, kind: input, shape index: {}]   ;;  %s3963_s10 = inlined_call_operand.vmem [shape: f32[1,256], index: 10, kind: input, shape index: {}]   ;;  %s3964_s11 = inlined_call_operand.hbm [shape: bf16[128,128], index: 11, kind: input, shape index: {}]   ;;  %s3965_s12 = inlined_call_operand.hbm [shape: f32[1,128], index: 12, kind: input, shape index: {}]   ;;  %s3966_s13 = inlined_call_operand.hbm [shape: bf16[128,128], index: 13, kind: input, shape index: {}]   ;;  %s3967_s14 = inlined_call_operand.hbm [shape: f32[1,128], index: 14, kind: input, shape index: {}]   ;;  %s3968_s15 = inlined_call_operand.vmem [shape: bf16[128,256], index: 15, kind: input, shape index: {}]   ;;  %s3969_s16 = inlined_call_operand.vmem [shape: f32[1,256], index: 16, kind: input, shape index: {}]   ;;  %s3970_s17 = inlined_call_operand.hbm [shape: bf16[128,128], index: 17, kind: input, shape index: {}]   ;;  %s3971_s18 = inlined_call_operand.vmem [shape: f32[1,128], index: 18, kind: input, shape index: {}]   ;;  %s3972_s19 = inlined_call_operand.vmem [shape: f32[2,9,128], index: 19, kind: output, shape index: {}]  }
   0x1   :  { %3980 = sst [smem:[#allocation21_spill]] %s3953_s0 }
   0x2   :  { %3981 = sst [smem:[#allocation22_spill]] %s3954_s1 }
   0x3   :  { %3982 = sst [smem:[#allocation23_spill]] %s3955_s2 }
   0x4   :  { %3983 = sst [smem:[#allocation24_spill]] %s3956_s3 }
   0x5   :  { %24 = vsyncpa [#allocation3], 0 }
   0x6   :  { %25 = vsyncpa [#allocation5], 0 }
   0x7   :  { %26 = vsyncpa [#allocation8], 0 }
   0x8   :  { %27 = vsyncpa [#allocation11], 0 }
   0x9   :  { %28 = vsyncpa [#allocation14], 0  ;;  %s3261_s0 = smov [#allocation4]   ;;  %s3262_s20 = smov [#allocation7]  }
   0xa   :  { %s58_s30 = sshll.u32 %s3261_s0, 4  ;;  %s80_s21 = sshll.u32 %s3262_s20, 4  ;;  %s59_s30 = int_to_ptr.vmem [resolvable:$true] %s58_s30  ;;  %s3378_s21 = int_to_ptr.vmem [resolvable:$true] %s80_s21 }
   0xb   :  { %s3053_s2 = scalar_lea.hbm %s3960_s7, 1024 }
   0xc   :  { %p3054_p0 = scmp.ne.s32.totalorder %s3960_s7, %s3053_s2  ;;  %p3057_p1 = scmp.lt.u32.totalorder %s3053_s2, %s3960_s7 }
   0xe   :  { %p3059_p2 = pnand %p3057_p1, %p3054_p0 }
  0x10   :  { %3062 = shalt.err (!%p3059_p2)
}
  0x11   :  { %s3063_s26 = scalar_lea.vmem %s59_s30, 1024  ;;  %p3068_p4 = scmp.lt.s32.totalorder %s59_s30, %s59_s30 }
  0x12   :  { %p3064_p3 = scmp.ne.s32.totalorder %s59_s30, %s3063_s26  ;;  %p3069_p5 = scmp.lt.s32.totalorder %s3063_s26, %s3063_s26 }
  0x14   :  { %p3070_p6 = por %p3069_p5, %p3068_p4 }
  0x16   :  { %p3071_p7 = pnand %p3070_p6, %p3064_p3 }
  0x18   :  { %3074 = shalt.err (!%p3071_p7)
}
  0x19   :  { %s3976_s27 = smov 64   ;;  %s3978_s28 = smov 4  }
  0x1a   :  { %64 = dma.hbm_to_vmem [thread:$0]  %s3960_s7, 1024, %s59_s30, [#allocation5], %s3976_s27, %s3976_s27, %s3978_s28  }
  0x1b   :  { %s3075_s22 = scalar_lea.hbm %s3962_s9, 2048 }
  0x1c   :  { %p3076_p8 = scmp.ne.s32.totalorder %s3962_s9, %s3075_s22  ;;  %p3079_p9 = scmp.lt.u32.totalorder %s3075_s22, %s3962_s9 }
  0x1e   :  { %p3081_p10 = pnand %p3079_p9, %p3076_p8 }
  0x20   :  { %3084 = shalt.err (!%p3081_p10)
}
  0x21   :  { %s3085_s3 = scalar_lea.vmem %s3378_s21, 2048  ;;  %p3090_p12 = scmp.lt.s32.totalorder %s3378_s21, %s3378_s21 }
  0x22   :  { %p3086_p11 = scmp.ne.s32.totalorder %s3378_s21, %s3085_s3  ;;  %p3091_p13 = scmp.lt.s32.totalorder %s3085_s3, %s3085_s3 }
  0x24   :  { %p3092_p0 = por %p3091_p13, %p3090_p12 }
  0x26   :  { %p3093_p1 = pnand %p3092_p0, %p3086_p11 }
  0x28   :  { %3096 = shalt.err (!%p3093_p1)
}
  0x29   :  { %s3265_s7 = smov 128   ;;  %s3266_s30 = smov 8  }
  0x2a   :  { %86 = dma.hbm_to_vmem [thread:$0]  %s3962_s9, 2048, %s3378_s21, [#allocation8], %s3265_s7, %s3265_s7, %s3266_s30  }
  0x2b   :  { %s3267_s0 = smov [#allocation10]   ;;  %s3268_s1 = smov [#allocation13]  }
  0x2c   :  { %s107_s20 = sshll.u32 %s3267_s0, 4  ;;  %s129_s22 = sshll.u32 %s3268_s1, 4  ;;  %s108_s20 = int_to_ptr.vmem [resolvable:$true] %s107_s20  ;;  %s130_s22 = int_to_ptr.vmem [resolvable:$true] %s129_s22 }
  0x2d   :  { %s3097_s24 = scalar_lea.hbm %s3965_s12, 16 }
  0x2e   :  { %p3098_p2 = scmp.ne.s32.totalorder %s3965_s12, %s3097_s24  ;;  %p3101_p3 = scmp.lt.u32.totalorder %s3097_s24, %s3965_s12 }
  0x30   :  { %p3103_p4 = pnand %p3101_p3, %p3098_p2 }
  0x32   :  { %3106 = shalt.err (!%p3103_p4)
}
  0x33   :  { %s3107_s9 = scalar_lea.vmem %s108_s20, 16  ;;  %s3111_s21 = scalar_lea.vmem %s108_s20, 32 }
  0x34   :  { %p3108_p5 = scmp.ne.s32.totalorder %s108_s20, %s3107_s9  ;;  %p3112_p6 = scmp.lt.s32.totalorder %s108_s20, %s108_s20 }
  0x35   :  { %p3113_p7 = scmp.lt.s32.totalorder %s3111_s21, %s3107_s9 }
  0x37   :  { %p3114_p8 = por %p3113_p7, %p3112_p6 }
  0x39   :  { %p3115_p9 = pnand %p3114_p8, %p3108_p5 }
  0x3b   :  { %3118 = shalt.err (!%p3115_p9)
}
  0x3c   :  { %110 = dma.hbm_to_vmem [thread:$0]  %s3965_s12, 16, %s108_s20, [#allocation11]  }
  0x3d   :  { %s3119_s0 = scalar_lea.hbm %s3967_s14, 16 }
  0x3e   :  { %p3120_p10 = scmp.ne.s32.totalorder %s3967_s14, %s3119_s0  ;;  %p3123_p11 = scmp.lt.u32.totalorder %s3119_s0, %s3967_s14 }
  0x40   :  { %p3125_p12 = pnand %p3123_p11, %p3120_p10 }
  0x42   :  { %3128 = shalt.err (!%p3125_p12)
}
  0x43   :  { %s3129_s23 = scalar_lea.vmem %s130_s22, 16  ;;  %s3133_s24 = scalar_lea.vmem %s130_s22, 32 }
  0x44   :  { %p3130_p13 = scmp.ne.s32.totalorder %s130_s22, %s3129_s23  ;;  %p3134_p0 = scmp.lt.s32.totalorder %s130_s22, %s130_s22 }
  0x45   :  { %p3135_p1 = scmp.lt.s32.totalorder %s3133_s24, %s3129_s23 }
  0x47   :  { %p3136_p2 = por %p3135_p1, %p3134_p0 }
  0x49   :  { %p3137_p3 = pnand %p3136_p2, %p3130_p13 }
  0x4b   :  { %3140 = shalt.err (!%p3137_p3)
}
  0x4c   :  { %132 = dma.hbm_to_vmem [thread:$0]  %s3967_s14, 16, %s130_s22, [#allocation14]  }
  0x4d   :  { %s3269_s25 = smov [#allocation2]   ;;  %s3270_s9 = smov [#allocation6]  }
  0x4e   :  { %s44_s3 = sshll.u32 %s3269_s25, 4  ;;  %s71_s21 = sshll.u32 %s3270_s9, 4  ;;  %s45_s3 = int_to_ptr.vmem [resolvable:$true] %s44_s3  ;;  %s72_s21 = int_to_ptr.vmem [resolvable:$true] %s71_s21 }
  0x4f   :  { %s3141_s26 = scalar_lea.hbm %s3958_s5, 1024 }
  0x50   :  { %p3142_p4 = scmp.ne.s32.totalorder %s3958_s5, %s3141_s26  ;;  %p3145_p5 = scmp.lt.u32.totalorder %s3141_s26, %s3958_s5 }
  0x52   :  { %p3147_p6 = pnand %p3145_p5, %p3142_p4 }
  0x54   :  { %3150 = shalt.err (!%p3147_p6)
}
  0x55   :  { %s3151_s14 = scalar_lea.vmem %s45_s3, 1024  ;;  %p3156_p8 = scmp.lt.s32.totalorder %s45_s3, %s45_s3 }
  0x56   :  { %p3152_p7 = scmp.ne.s32.totalorder %s45_s3, %s3151_s14  ;;  %p3157_p9 = scmp.lt.s32.totalorder %s3151_s14, %s3151_s14 }
  0x58   :  { %p3158_p10 = por %p3157_p9, %p3156_p8 }
  0x5a   :  { %p3159_p11 = pnand %p3158_p10, %p3152_p7 }
  0x5c   :  { %3162 = shalt.err (!%p3159_p11)
}
  0x5d   :  { %s3984_s22 = smov 4   ;;  %s3985_s1 = smov 64  }
  0x5e   :  { %50 = dma.hbm_to_vmem [thread:$0]  %s3958_s5, 1024, %s45_s3, [#allocation3], %s3985_s1, %s3985_s1, %s3984_s22  }
  0x5f   :  { %s3163_s20 = scalar_lea.hbm %s3961_s8, 16 }
  0x60   :  { %p3164_p12 = scmp.ne.s32.totalorder %s3961_s8, %s3163_s20  ;;  %p3167_p13 = scmp.lt.u32.totalorder %s3163_s20, %s3961_s8 }
  0x62   :  { %p3169_p0 = pnand %p3167_p13, %p3164_p12 }
  0x64   :  { %3172 = shalt.err (!%p3169_p0)
}
  0x65   :  { %s3173_s26 = scalar_lea.vmem %s72_s21, 16  ;;  %s3177_s29 = scalar_lea.vmem %s72_s21, 32 }
  0x66   :  { %p3174_p1 = scmp.ne.s32.totalorder %s72_s21, %s3173_s26  ;;  %p3178_p2 = scmp.lt.s32.totalorder %s72_s21, %s72_s21 }
  0x67   :  { %p3179_p3 = scmp.lt.s32.totalorder %s3177_s29, %s3173_s26 }
  0x69   :  { %p3180_p4 = por %p3179_p3, %p3178_p2 }
  0x6b   :  { %p3181_p5 = pnand %p3180_p4, %p3174_p1 }
  0x6d   :  { %3184 = shalt.err (!%p3181_p5)
}
  0x6e   :  { %74 = dma.hbm_to_vmem [thread:$0]  %s3961_s8, 16, %s72_s21, [#allocation5]  }
  0x6f   :  { %s3271_s0 = smov [#allocation9]   ;;  %s3272_s28 = smov [#allocation12]  }
  0x70   :  { %s94_s27 = sshll.u32 %s3271_s0, 4  ;;  %s116_s14 = sshll.u32 %s3272_s28, 4  ;;  %s95_s27 = int_to_ptr.vmem [resolvable:$true] %s94_s27  ;;  %s3463_s14 = int_to_ptr.vmem [resolvable:$true] %s116_s14 }
  0x71   :  { %s3185_s24 = scalar_lea.hbm %s3964_s11, 1024 }
  0x72   :  { %p3186_p6 = scmp.ne.s32.totalorder %s3964_s11, %s3185_s24  ;;  %p3189_p7 = scmp.lt.u32.totalorder %s3185_s24, %s3964_s11 }
  0x74   :  { %p3191_p8 = pnand %p3189_p7, %p3186_p6 }
  0x76   :  { %3194 = shalt.err (!%p3191_p8)
}
  0x77   :  { %s3195_s8 = scalar_lea.vmem %s95_s27, 1024  ;;  %p3200_p10 = scmp.lt.s32.totalorder %s95_s27, %s95_s27 }
  0x78   :  { %p3196_p9 = scmp.ne.s32.totalorder %s95_s27, %s3195_s8  ;;  %p3201_p11 = scmp.lt.s32.totalorder %s3195_s8, %s3195_s8 }
  0x7a   :  { %p3202_p12 = por %p3201_p11, %p3200_p10 }
  0x7c   :  { %p3203_p13 = pnand %p3202_p12, %p3196_p9 }
  0x7e   :  { %3206 = shalt.err (!%p3203_p13)
}
  0x7f   :  { %100 = dma.hbm_to_vmem [thread:$0]  %s3964_s11, 1024, %s95_s27, [#allocation8], %s3985_s1, %s3985_s1, %s3984_s22  }
  0x80   :  { %s3207_s29 = scalar_lea.hbm %s3966_s13, 1024 }
  0x81   :  { %p3208_p0 = scmp.ne.s32.totalorder %s3966_s13, %s3207_s29  ;;  %p3211_p1 = scmp.lt.u32.totalorder %s3207_s29, %s3966_s13 }
  0x83   :  { %p3213_p2 = pnand %p3211_p1, %p3208_p0 }
  0x85   :  { %3216 = shalt.err (!%p3213_p2)
}
  0x86   :  { %s3217_s2 = scalar_lea.vmem %s3463_s14, 1024  ;;  %p3222_p4 = scmp.lt.s32.totalorder %s3463_s14, %s3463_s14 }
  0x87   :  { %p3218_p3 = scmp.ne.s32.totalorder %s3463_s14, %s3217_s2  ;;  %p3223_p5 = scmp.lt.s32.totalorder %s3217_s2, %s3217_s2 }
  0x89   :  { %p3224_p6 = por %p3223_p5, %p3222_p4 }
  0x8b   :  { %p3225_p7 = pnand %p3224_p6, %p3218_p3 }
  0x8d   :  { %3228 = shalt.err (!%p3225_p7)
}
  0x8e   :  { %122 = dma.hbm_to_vmem [thread:$0]  %s3966_s13, 1024, %s3463_s14, [#allocation11], %s3985_s1, %s3985_s1, %s3984_s22  }
  0x8f   :  { %s3273_s23 = smov [#allocation15]   ;;  %s3229_s25 = scalar_lea.hbm %s3970_s17, 1024 }
  0x90   :  { %s142_s24 = sshll.u32 %s3273_s23, 4  ;;  %p3230_p8 = scmp.ne.s32.totalorder %s3970_s17, %s3229_s25  ;;  %s143_s24 = int_to_ptr.vmem [resolvable:$true] %s142_s24 }
  0x91   :  { %p3233_p9 = scmp.lt.u32.totalorder %s3229_s25, %s3970_s17 }
  0x93   :  { %p3235_p10 = pnand %p3233_p9, %p3230_p8 }
  0x95   :  { %3238 = shalt.err (!%p3235_p10)
}
  0x96   :  { %s3239_s30 = scalar_lea.vmem %s143_s24, 1024  ;;  %p3244_p12 = scmp.lt.s32.totalorder %s143_s24, %s143_s24 }
  0x97   :  { %p3240_p11 = scmp.ne.s32.totalorder %s143_s24, %s3239_s30  ;;  %p3245_p13 = scmp.lt.s32.totalorder %s3239_s30, %s3239_s30 }
  0x99   :  { %p3246_p0 = por %p3245_p13, %p3244_p12 }
  0x9b   :  { %p3247_p1 = pnand %p3246_p0, %p3240_p11 }
  0x9d   :  { %3250 = shalt.err (!%p3247_p1)
}
  0x9e   :  { %148 = dma.hbm_to_vmem [thread:$0]  %s3970_s17, 1024, %s143_s24, [#allocation14], %s3985_s1, %s3985_s1, %s3984_s22  }
  0x9f   :  { %3251 = dma.done.wait [#allocation3], 1024  }
  0xa0   :  { %3252 = vsyncadd [#allocation3], 4294966272 }
  0xa1   :  { %3253 = dma.done.wait [#allocation5], 1040  }
  0xa2   :  { %3254 = vsyncadd [#allocation5], 4294966256 }
  0xa3   :  { %3255 = dma.done.wait [#allocation8], 3072  }
  0xa4   :  { %3256 = vsyncadd [#allocation8], 4294964224 }
  0xa5   :  { %3257 = dma.done.wait [#allocation11], 1040  }
  0xa6   :  { %3258 = vsyncadd [#allocation11], 4294966256 }
  0xa7   :  { %3259 = dma.done.wait [#allocation14], 1040  }
  0xa8   :  { %3260 = vsyncadd [#allocation14], 4294966256  ;;  %vm307_vm0 = vcmask 1040384   ;;  %v3274_v0 = vmov 0.0   ;;  %vm308_vm1 = vcmask 1041408   ;;  %v3275_v1 = vmov 65535  }
  0xa9   :  { %2672 = vmatprep.subr.bf16.mxu1 %v3274_v0  ;;  %2652 = vmatprep.subr.bf16.mxu0 %v3274_v0  ;;  %v309_v2 = vsel %vm307_vm0, 4294967295, %v3275_v1  ;;  %vm3276_vm2 = vmmov 0   ;;  %s3986_s1 = sld [smem:[#allocation24_spill]]  ;;  %s3987_s5 = sld [smem:[#allocation21_spill]]  ;;  %vm303_vm3 = vcmask 23552   ;;  %v2909_v9 = vld [vmem:[#allocation2] sm:$0xff]  }
  0xaa   :  { %2674 = vmatprep.mubr.msk.bf16.mxu1 %vm3276_vm2, %v3274_v0  ;;  %2668 = vmatprep.mubr.msk.bf16.mxu0 %vm3276_vm2, %v3274_v0  ;;  %v3522_v3 = vsel %vm308_vm1, %v309_v2, 0  ;;  %v2910_v10 = vld [vmem:[#allocation2 + $0x8] sm:$0xff]   ;;  %v2911_v11 = vld [vmem:[#allocation2 + $0x10] sm:$0xff]   ;;  %v2912_v12 = vld [vmem:[#allocation2 + $0x18] sm:$0xff]   ;;  %s3988_s11 = sld [smem:[#allocation23_spill]]  ;;  %v3277_v53 = vmov 0  }
  0xab   :  { %v2913_v13 = vld [vmem:[#allocation2 + $0x20] sm:$0xff]   ;;  %v2914_v14 = vld [vmem:[#allocation2 + $0x28] sm:$0xff]   ;;  %v2915_v15 = vld [vmem:[#allocation2 + $0x30] sm:$0xff]   ;;  %vm664_vm4 = vcmask 130048   ;;  %s3989_s22 = sld [smem:[#allocation22_spill]]  ;;  %vm1180_vm5 = vcmask 1043456  }
  0xac   :  { %v2916_v16 = vld [vmem:[#allocation2 + $0x38] sm:$0xff]   ;;  %v2917_v17 = vld [vmem:[#allocation4] sm:$0xff]   ;;  %v2918_v18 = vld [vmem:[#allocation4 + $0x8] sm:$0xff]   ;;  %vm1181_vm6 = vcmask 1044480   ;;  %vm1151_vm7 = vcmask 72704   ;;  %vm1155_vm8 = vcmask 65536  }
  0xad   :  { %2653 = vmatpush3.bf16.msra.mxu0 %v2917_v17  ;;  %v2919_v19 = vld [vmem:[#allocation4 + $0x10] sm:$0xff]   ;;  %v2920_v20 = vld [vmem:[#allocation4 + $0x18] sm:$0xff]   ;;  %v2921_v21 = vld [vmem:[#allocation4 + $0x20] sm:$0xff]  }
  0xae   :  { %2654 = vmatprep.subr.bf16.mxu0 %v3274_v0  ;;  %v2922_v22 = vld [vmem:[#allocation4 + $0x28] sm:$0xff]   ;;  %v2923_v23 = vld [vmem:[#allocation4 + $0x30] sm:$0xff]   ;;  %v2924_v24 = vld [vmem:[#allocation4 + $0x38] sm:$0xff]  }
  0xaf   :  { %v294_v4 = vld [vmem:[%s3986_s1] sm:$0x3]  ;;  %v293_v7 = vld [vmem:[%s3987_s5 + $0x8] sm:$0xff]  ;;  %v3564_v30 = vld [vmem:[#allocation7 + $0x10] ss:$8 sps:$4 sm:$0xff]  }
  0xb0   :  { %v292_v5 = vld [vmem:[%s3987_s5] sm:$0xff]  ;;  %v312_v6 = vand.u32 %v3522_v3, %v294_v4  ;;  %v3576_v34 = vld [vmem:[#allocation7 + $0x30] ss:$8 sps:$4 sm:$0xff]  }
  0xb1   :  { %v295_v8 = vpack.c.bf16 %v293_v7, %v292_v5  ;;  %2655 = vmatpush3.bf16.msra.mxu0 %v2918_v18  ;;  %v179_v25 = vld [vmem:[%s3988_s11] sm:$0xff]  ;;  %v3588_v38 = vld [vmem:[#allocation7 + $0x50] ss:$8 sps:$4 sm:$0xff]   ;;  %v489_v5 = vlaneseq }
  0xb2   :  { %2673 = vmatpush3.bf16.msra.mxu1 %v312_v6  ;;  %2656 = vmatprep.subr.bf16.mxu0 %v3274_v0  ;;  %v3556_v26 = vld [vmem:[#allocation7 + $0x4] ss:$8 sps:$4 sm:$0xff]   ;;  %v196_v27 = vpack.c.bf16 %v179_v25, %v179_v25  ;;  %v3558_v28 = vld [vmem:[#allocation7] ss:$8 sps:$4 sm:$0xff]   ;;  %v3561_v29 = vld [vmem:[#allocation7 + $0x14] ss:$8 sps:$4 sm:$0xff]  }
  0xb3   :  { %2678 = vmatprep.subr.bf16.mxu1 %v3274_v0  ;;  %v3567_v31 = vld [vmem:[#allocation7 + $0x24] ss:$8 sps:$4 sm:$0xff]   ;;  %v3570_v32 = vld [vmem:[#allocation7 + $0x20] ss:$8 sps:$4 sm:$0xff]   ;;  %v3573_v33 = vld [vmem:[#allocation7 + $0x34] ss:$8 sps:$4 sm:$0xff]  }
  0xb4   :  { %v3579_v35 = vld [vmem:[#allocation7 + $0x44] ss:$8 sps:$4 sm:$0xff]   ;;  %v3582_v36 = vld [vmem:[#allocation7 + $0x40] ss:$8 sps:$4 sm:$0xff]   ;;  %v3585_v37 = vld [vmem:[#allocation7 + $0x54] ss:$8 sps:$4 sm:$0xff]  }
  0xb5   :  { %2675 = vmatmul.mubr.msk.bf16.vlgmr.msra.gmra.mrb[0].mxu1 %vm303_vm3, %v295_v8  ;;  %2657 = vmatpush3.bf16.msra.mxu0 %v2919_v19  ;;  %v3591_v39 = vld [vmem:[#allocation7 + $0x64] ss:$8 sps:$4 sm:$0xff]   ;;  %v3594_v40 = vld [vmem:[#allocation7 + $0x60] ss:$8 sps:$4 sm:$0xff]   ;;  %v3601_v41 = vld [vmem:[%s3957_s4] ss:$0 sm:$0xff] }
  0xb6   :  { %2679 = vmatpush3.bf16.msra.mxu1 %v2909_v9  ;;  %2694 = vmatprep.mubr.msk.bf16.mxu1 %vm3276_vm2, %v3274_v0  ;;  %v3607_v51 = vld [vmem:[#allocation7 + $0x74] ss:$8 sps:$4 sm:$0xff]   ;;  %v3609_v52 = vld [vmem:[#allocation7 + $0x70] ss:$8 sps:$4 sm:$0xff]   ;;  %v490_v6 = vshrl.u32 %v489_v5, 7 }
  0xb7   :  { %2680 = vmatprep.subr.bf16.mxu1 %v3274_v0  ;;  %2658 = vmatprep.subr.bf16.mxu0 %v3274_v0  ;;  %v3618_v58 = vld [vmem:[%s3959_s6] ss:$0 sm:$0xff]  ;;  %v3655_v5 = vld [vmem:[%s3968_s15 + $0x4] ss:$8 sps:$4 sm:$0xff]  }
  0xb8   :  { %v3624_v7 = vsub.s32 0, %v490_v6  ;;  %v487_v8 = vld [vmem:[%s3963_s10] sm:$0x3]  ;;  %v3629_v9 = vsub.s32 1, %v490_v6  ;;  %v2963_v6 = vld [vmem:[#allocation12] sm:$0xff]  }
  0xb9   :  { %2659 = vmatpush3.bf16.msra.mxu0 %v2920_v20  ;;  %v2392_v20 = vld [vmem:[#allocation6] ss:$0 sm:$0xff] }
  0xba   :  { %2681 = vmatpush3.bf16.msra.mxu1 %v2910_v10  ;;  %2660 = vmatprep.subr.bf16.mxu0 %v3274_v0  ;;  %v492_v10 = vrot.slane %v487_v8, %v3624_v7 }
  0xbb   :  { %2682 = vmatprep.subr.bf16.mxu1 %v3274_v0 }
  0xbd   :  { %2661 = vmatpush3.bf16.msra.mxu0 %v2921_v21 }
  0xbe   :  { %2683 = vmatpush3.bf16.msra.mxu1 %v2911_v11  ;;  %2662 = vmatprep.subr.bf16.mxu0 %v3274_v0 }
  0xbf   :  { %2684 = vmatprep.subr.bf16.mxu1 %v3274_v0 }
  0xc1   :  { %2663 = vmatpush3.bf16.msra.mxu0 %v2922_v22 }
  0xc2   :  { %2685 = vmatpush3.bf16.msra.mxu1 %v2912_v12  ;;  %2664 = vmatprep.subr.bf16.mxu0 %v3274_v0  ;;  %v496_v12 = vrot.slane %v487_v8, %v3629_v9  ;;  %v2967_v8 = vld [vmem:[#allocation12 + $0x8] sm:$0xff]  }
  0xc3   :  { %2686 = vmatprep.subr.bf16.mxu1 %v3274_v0 }
  0xc5   :  { %2665 = vmatpush3.bf16.msra.mxu0 %v2923_v23 }
  0xc6   :  { %2687 = vmatpush3.bf16.msra.mxu1 %v2913_v13  ;;  %2666 = vmatprep.subr.bf16.mxu0 %v3274_v0 }
  0xc7   :  { %2688 = vmatprep.subr.bf16.mxu1 %v3274_v0 }
  0xc9   :  { %2667 = vmatpush3.bf16.msra.mxu0 %v2924_v24 }
  0xca   :  { %2689 = vmatpush3.bf16.msra.mxu1 %v2914_v14  ;;  %579 = vmatprep.subr.bf16.mxu0 %v3556_v26 }
  0xcb   :  { %2690 = vmatprep.subr.bf16.mxu1 %v3274_v0 }
  0xcc   :  { %2669 = vmatmul.mubr.bf16.vlgmr.msra.gmra.mrb[0].mxu0 %v196_v27 }
  0xcd   :  { %580 = vmatpush1.bf16.msra.mxu0 %v3558_v28  ;;  %611 = vmatprep.mubr.bf16.mxu0 %v3277_v53 }
  0xce   :  { %2691 = vmatpush3.bf16.msra.mxu1 %v2915_v15  ;;  %581 = vmatprep.subr.bf16.mxu0 %v3561_v29 }
  0xcf   :  { %2692 = vmatprep.subr.bf16.mxu1 %v3274_v0 }
  0xd1   :  { %582 = vmatpush1.bf16.msra.mxu0 %v3564_v30 }
  0xd2   :  { %2693 = vmatpush3.bf16.msra.mxu1 %v2916_v16  ;;  %583 = vmatprep.subr.bf16.mxu0 %v3567_v31 }
  0xd3   :  { %2698 = vmatprep.subr.bf16.mxu1 %v3274_v0 }
  0xd5   :  { %584 = vmatpush1.bf16.msra.mxu0 %v3570_v32 }
  0xd6   :  { %585 = vmatprep.subr.bf16.mxu0 %v3573_v33 }
  0xd9   :  { %586 = vmatpush1.bf16.msra.mxu0 %v3576_v34 }
  0xda   :  { %587 = vmatprep.subr.bf16.mxu0 %v3579_v35 }
  0xdd   :  { %588 = vmatpush1.bf16.msra.mxu0 %v3582_v36 }
  0xde   :  { %589 = vmatprep.subr.bf16.mxu0 %v3585_v37 }
  0xe1   :  { %590 = vmatpush1.bf16.msra.mxu0 %v3588_v38 }
  0xe2   :  { %591 = vmatprep.subr.bf16.mxu0 %v3591_v39 }
  0xe5   :  { %592 = vmatpush1.bf16.msra.mxu0 %v3594_v40 }
  0xe6   :  { %593 = vmatprep.subr.bf16.mxu0 %v3607_v51 }
  0xe9   :  { %594 = vmatpush1.bf16.msra.mxu0 %v3609_v52 }
  0xea   :  { %2730 = vmatprep.subr.bf16.mxu0 %v3274_v0 }
 0x188   :  { %v348_v42 = vpop.f32.mrb[0].mxu1 }
 0x189   :  { %v349_v43 = vadd.f32 %v3601_v41, %v348_v42  ;;  %v2676_v44 = vpop.f32.mrb[1].mxu1 }
 0x18a   :  { %v351_v45 = vpop.f32.mrb[2].mxu1 }
 0x18b   :  { %v352_v46 = vadd.f32 %v3601_v41, %v351_v45  ;;  %v2677_v47 = vpop.f32.mrb[3].mxu1  ;;  %v355_v48 = vmax.f32 %v349_v43, 0.0 }
 0x18d   :  { %v356_v49 = vmax.f32 %v352_v46, 0.0 }
 0x18f   :  { %v373_v50 = vpack.c.bf16 %v356_v49, %v355_v48 }
 0x191   :  { %2695 = vmatmul.mubr.bf16.vlgmr.msra.gmra.mrb[4].mxu1 %v373_v50 }
 0x192   :  { %2700 = vmatprep.mubr.msk.bf16.mxu1 %vm3276_vm2, %v3274_v0 }
 0x19f   :  { %v286_v54 = vpop.f32.mrb[0].mxu0 }
 0x1a0   :  { %v2670_v55 = vpop.f32.mrb[1].mxu0  ;;  %v287_v23 = vadd.f32 %v2392_v20, %v286_v54  ;;  %v3693_v20 = vld [vmem:[%s3968_s15 + $0x34] ss:$8 sps:$4 sm:$0xff]  }
 0x1a1   :  { %v289_v56 = vpop.f32.mrb[2].mxu0 }
 0x1a2   :  { %v2671_v57 = vpop.f32.mrb[3].mxu0  ;;  %v3634_v24 = vpack.c.bf16 %v287_v23, %v287_v23  ;;  %v2949_v56 = vld [vmem:[#allocation9] sm:$0xff]  }
 0x1a3   :  { %v3707_v23 = vld [vmem:[%s3968_s15 + $0x44] ss:$8 sps:$4 sm:$0xff]  }
 0x264   :  { %v463_v59 = vpop.f32.mrb[4].mxu1 }
 0x265   :  { %v2696_v60 = vpop.f32.mrb[5].mxu1  ;;  %v464_v62 = vadd.f32 %v3618_v58, %v463_v59  ;;  %v2950_v59 = vld [vmem:[#allocation9 + $0x8] sm:$0xff]  }
 0x266   :  { %v466_v61 = vpop.f32.mrb[6].mxu1  ;;  %v2951_v60 = vld [vmem:[#allocation9 + $0x10] sm:$0xff]  }
 0x267   :  { %v467_v63 = vadd.f32 %v3618_v58, %v466_v61  ;;  %v2697_v2 = vpop.f32.mrb[7].mxu1  ;;  %v2952_v61 = vld [vmem:[#allocation9 + $0x18] sm:$0xff]  }
 0x268   :  { %v2955_v2 = vld [vmem:[#allocation9 + $0x30] sm:$0xff]  }
 0x269   :  { %v486_v4 = vpack.c.bf16 %v467_v63, %v464_v62  ;;  %v2953_v62 = vld [vmem:[#allocation9 + $0x20] sm:$0xff]   ;;  %v2954_v63 = vld [vmem:[#allocation9 + $0x28] sm:$0xff]  }
 0x26b   :  { %612 = vmatmul.mubr.bf16.vlgmr.msra.gmra.mrb[4].mxu0 %v486_v4  ;;  %v2956_v4 = vld [vmem:[#allocation9 + $0x38] sm:$0xff]  }
 0x26c   :  { %2746 = vmatprep.mubr.msk.bf16.mxu0 %vm3276_vm2, %v3274_v0  ;;  %2731 = vmatpush3.bf16.msra.mxu0 %v2963_v6 }
 0x26d   :  { %2732 = vmatprep.subr.bf16.mxu0 %v3274_v0 }
 0x270   :  { %2733 = vmatpush3.bf16.msra.mxu0 %v2967_v8 }
 0x271   :  { %2734 = vmatprep.subr.bf16.mxu0 %v3274_v0 }
 0x33e   :  { %v613_v11 = vpop.f32.mrb[4].mxu0 }
 0x33f   :  { %v615_v13 = vpop.f32.mrb[5].mxu0  ;;  %v614_v15 = vadd.f32 %v613_v11, %v492_v10  ;;  %v3663_v11 = vld [vmem:[%s3968_s15] ss:$8 sps:$4 sm:$0xff]  }
 0x340   :  { %v617_v14 = vpop.f32.mrb[6].mxu0  ;;  %v616_v18 = vadd.f32 %v615_v13, %v496_v12 }
 0x341   :  { %v618_v16 = vadd.f32 %v617_v14, %v492_v10  ;;  %v619_v17 = vpop.f32.mrb[7].mxu0  ;;  %v3668_v14 = vld [vmem:[%s3968_s15 + $0x14] ss:$8 sps:$4 sm:$0xff]  }
 0x342   :  { %v620_v19 = vadd.f32 %v619_v17, %v496_v12  ;;  %v3674_v17 = vld [vmem:[%s3968_s15 + $0x10] ss:$8 sps:$4 sm:$0xff]  }
 0x343   :  { %v623_v21 = vpack.c.bf16 %v618_v16, %v614_v15 }
 0x344   :  { %v677_v22 = vpack.c.bf16 %v620_v19, %v616_v18  ;;  %v3681_v18 = vld [vmem:[%s3968_s15 + $0x24] ss:$8 sps:$4 sm:$0xff]   ;;  %v3687_v19 = vld [vmem:[%s3968_s15 + $0x20] ss:$8 sps:$4 sm:$0xff]  }
 0x345   :  { %2699 = vmatpush3.bf16.xpose.msra.mxu1 %v623_v21  ;;  %v3699_v21 = vld [vmem:[%s3968_s15 + $0x30] ss:$8 sps:$4 sm:$0xff]  }
 0x346   :  { %2704 = vmatprep.subr.bf16.mxu1 %v3274_v0 }
 0x34c   :  { %2701 = vmatmul.mubr.bf16.vlgmr.msra.gmra.mrb[8].mxu1 %v3634_v24 }
 0x34d   :  { %2705 = vmatpush3.bf16.msra.mxu1 %v677_v22  ;;  %2706 = vmatprep.mubr.msk.bf16.mxu1 %vm3276_vm2, %v3274_v0  ;;  %v2971_v22 = vld [vmem:[#allocation12 + $0x10] sm:$0xff]  }
 0x34e   :  { %2710 = vmatprep.subr.bf16.mxu1 %v3274_v0  ;;  %2735 = vmatpush3.bf16.msra.mxu0 %v2971_v22 }
 0x34f   :  { %2736 = vmatprep.subr.bf16.mxu0 %v3274_v0 }
 0x41f   :  { %v658_v25 = vpop.f32.mrb[8].mxu1 }
 0x420   :  { %v2702_v27 = vpop.f32.mrb[9].mxu1  ;;  %v665_v42 = vsel %vm664_vm4, %v658_v25, -inf }
 0x421   :  { %666 = vmax.xlane.f32.xlu0 %v665_v42  ;;  %v661_v43 = vpop.f32.mrb[10].mxu1  ;;  %v2975_v27 = vld [vmem:[#allocation12 + $0x18] sm:$0xff]  }
 0x422   :  { %v2703_v44 = vpop.f32.mrb[11].mxu1  ;;  %2737 = vmatpush3.bf16.msra.mxu0 %v2975_v27  ;;  %v3720_v42 = vld [vmem:[%s3968_s15 + $0x54] ss:$8 sps:$4 sm:$0xff]   ;;  %v3725_v43 = vld [vmem:[%s3968_s15 + $0x50] ss:$8 sps:$4 sm:$0xff]  }
 0x423   :  { %2738 = vmatprep.subr.bf16.mxu0 %v3274_v0  ;;  %v2979_v44 = vld [vmem:[#allocation12 + $0x20] sm:$0xff]  }
 0x426   :  { %2739 = vmatpush3.bf16.msra.mxu0 %v2979_v44 }
 0x427   :  { %2740 = vmatprep.subr.bf16.mxu0 %v3274_v0 }
 0x4ae   :  { %v667_v45 = vpop.xlane.xlu0 %666 }
 0x4af   :  { %v668_v46 = vsub.f32 %v658_v25, %v667_v45  ;;  %v3712_v25 = vld [vmem:[%s3968_s15 + $0x40] ss:$8 sps:$4 sm:$0xff]   ;;  %v3733_v45 = vld [vmem:[%s3968_s15 + $0x64] ss:$8 sps:$4 sm:$0xff]  }
 0x4b1   :  { %v669_v47 = vmul.f32 1.442695, %v668_v46  ;;  %v3738_v46 = vld [vmem:[%s3968_s15 + $0x60] ss:$8 sps:$4 sm:$0xff]  }
 0x4b3   :  { %3029 = vpow2.f32 %v669_v47  ;;  %v2983_v47 = vld [vmem:[#allocation12 + $0x28] sm:$0xff]  }
 0x4b4   :  { %2741 = vmatpush3.bf16.msra.mxu0 %v2983_v47  ;;  %v3771_v47 = vld [vmem:[#allocation13] ss:$0 sm:$0xff] }
 0x4b5   :  { %2742 = vmatprep.subr.bf16.mxu0 %v3274_v0 }
 0x4bd   :  { %v3030_v48 = vpop.eup %3029 }
 0x4be   :  { %v671_v49 = vsel %vm664_vm4, %v3030_v48, 0.0 }
 0x4bf   :  { %672 = vadd.xlane.f32.xlu0 %v671_v49  ;;  %v3751_v49 = vld [vmem:[%s3968_s15 + $0x70] ss:$8 sps:$4 sm:$0xff]  }
 0x54c   :  { %v673_v50 = vpop.xlane.xlu0 %672 }
 0x54d   :  { %3031 = vrcp.f32 %v673_v50  ;;  %v2987_v50 = vld [vmem:[#allocation12 + $0x30] sm:$0xff]  }
 0x54e   :  { %2743 = vmatpush3.bf16.msra.mxu0 %v2987_v50 }
 0x54f   :  { %2744 = vmatprep.subr.bf16.mxu0 %v3274_v0 }
 0x557   :  { %v3032_v54 = vpop.eup %3031 }
 0x558   :  { %v675_v55 = vmul.f32 %v3032_v54, %v3030_v48  ;;  %v3746_v48 = vld [vmem:[%s3968_s15 + $0x74] ss:$8 sps:$4 sm:$0xff]  }
 0x559   :  { %v2988_v54 = vld [vmem:[#allocation12 + $0x38] sm:$0xff]  }
 0x55a   :  { %v676_v57 = vpack.c.bf16 %v675_v55, %v675_v55  ;;  %v841_v55 = vld [vmem:[%s3989_s22] sm:$0xff]  ;;  %2745 = vmatpush3.bf16.msra.mxu0 %v2988_v54 }
 0x55b   :  { %2756 = vmatprep.subr.bf16.mxu0 %v3274_v0 }
 0x55c   :  { %2707 = vmatmul.mubr.msk.bf16.vlgmr.msra.gmra.mrb[12].mxu1 %vm664_vm4, %v676_v57 }
 0x55d   :  { %2711 = vmatpush3.bf16.msra.mxu1 %v2949_v56  ;;  %2726 = vmatprep.mubr.msk.bf16.mxu1 %vm3276_vm2, %v3274_v0  ;;  %v842_v56 = vld [vmem:[%s3989_s22 + $0x8] sm:$0x1] }
 0x55e   :  { %2712 = vmatprep.subr.bf16.mxu1 %v3274_v0  ;;  %v859_v57 = vpack.c.bf16 %v842_v56, %v841_v55 }
 0x560   :  { %2747 = vmatmul.mubr.bf16.vlgmr.msra.gmra.mrb[8].mxu0 %v859_v57  ;;  %v973_v57 = vld [vmem:[%s3969_s16] sm:$0x3] }
 0x561   :  { %2713 = vmatpush3.bf16.msra.mxu1 %v2950_v59  ;;  %2758 = vmatprep.mubr.msk.bf16.mxu0 %vm3276_vm2, %v3274_v0  ;;  %v3766_v59 = vld [vmem:[#allocation10] ss:$0 sm:$0xff] }
 0x562   :  { %2714 = vmatprep.subr.bf16.mxu1 %v3274_v0 }
 0x565   :  { %2715 = vmatpush3.bf16.msra.mxu1 %v2951_v60 }
 0x566   :  { %2716 = vmatprep.subr.bf16.mxu1 %v3274_v0 }
 0x569   :  { %2717 = vmatpush3.bf16.msra.mxu1 %v2952_v61 }
 0x56a   :  { %2718 = vmatprep.subr.bf16.mxu1 %v3274_v0 }
 0x56d   :  { %2719 = vmatpush3.bf16.msra.mxu1 %v2953_v62 }
 0x56e   :  { %2720 = vmatprep.subr.bf16.mxu1 %v3274_v0 }
 0x571   :  { %2721 = vmatpush3.bf16.msra.mxu1 %v2954_v63 }
 0x572   :  { %2722 = vmatprep.subr.bf16.mxu1 %v3274_v0 }
 0x575   :  { %2723 = vmatpush3.bf16.msra.mxu1 %v2955_v2 }
 0x576   :  { %2724 = vmatprep.subr.bf16.mxu1 %v3274_v0 }
 0x579   :  { %2725 = vmatpush3.bf16.msra.mxu1 %v2956_v4 }
 0x57a   :  { %1065 = vmatprep.subr.bf16.mxu1 %v3655_v5 }
 0x62f   :  { %v715_v10 = vpop.f32.mrb[12].mxu1 }
 0x630   :  { %v737_v12 = vpack.c.bf16 %v715_v10, %v715_v10  ;;  %v2708_v13 = vpop.f32.mrb[13].mxu1 }
 0x631   :  { %v718_v15 = vpop.f32.mrb[14].mxu1 }
 0x632   :  { %v2709_v16 = vpop.f32.mrb[15].mxu1  ;;  %2727 = vmatmul.mubr.bf16.vlgmr.msra.gmra.mrb[16].mxu1 %v737_v12 }
 0x633   :  { %1066 = vmatpush1.bf16.msra.mxu1 %v3663_v11  ;;  %1097 = vmatprep.mubr.bf16.mxu1 %v3277_v53  ;;  %v949_v22 = vpop.f32.mrb[8].mxu0 }
 0x634   :  { %1067 = vmatprep.subr.bf16.mxu1 %v3668_v14  ;;  %v2748_v27 = vpop.f32.mrb[9].mxu0  ;;  %v950_v54 = vadd.f32 %v3771_v47, %v949_v22 }
 0x635   :  { %v952_v44 = vpop.f32.mrb[10].mxu0  ;;  %v1346_v27 = vld [vmem:[%s3986_s1] sm:$0x3] }
 0x636   :  { %v2749_v50 = vpop.f32.mrb[11].mxu0  ;;  %v953_v55 = vadd.f32 %v3771_v47, %v952_v44 }
 0x637   :  { %1068 = vmatpush1.bf16.msra.mxu1 %v3674_v17  ;;  %v2473_v50 = vld [vmem:[%s3987_s5 + $0x10] sm:$0xff] }
 0x638   :  { %1069 = vmatprep.subr.bf16.mxu1 %v3681_v18  ;;  %v1108_v56 = vpack.c.bf16 %v953_v55, %v950_v54  ;;  %v2474_v54 = vld [vmem:[%s3987_s5 + $0x18] sm:$0xff] }
 0x639   :  { %v1347_v55 = vpack.c.bf16 %v2474_v54, %v2473_v50  ;;  %v2992_v54 = vld [vmem:[#allocation2 + $0x18] sm:$0xff]  }
 0x63b   :  { %1070 = vmatpush1.bf16.msra.mxu1 %v3687_v19 }
 0x63c   :  { %1071 = vmatprep.subr.bf16.mxu1 %v3693_v20 }
 0x63f   :  { %1072 = vmatpush1.bf16.msra.mxu1 %v3699_v21 }
 0x640   :  { %1073 = vmatprep.subr.bf16.mxu1 %v3707_v23 }
 0x643   :  { %1074 = vmatpush1.bf16.msra.mxu1 %v3712_v25 }
 0x644   :  { %1075 = vmatprep.subr.bf16.mxu1 %v3720_v42 }
 0x647   :  { %1076 = vmatpush1.bf16.msra.mxu1 %v3725_v43 }
 0x648   :  { %1077 = vmatprep.subr.bf16.mxu1 %v3733_v45 }
 0x64b   :  { %1078 = vmatpush1.bf16.msra.mxu1 %v3738_v46 }
 0x64c   :  { %1079 = vmatprep.subr.bf16.mxu1 %v3746_v48 }
 0x64f   :  { %1080 = vmatpush1.bf16.msra.mxu1 %v3751_v49 }
 0x650   :  { %2750 = vmatprep.subr.bf16.mxu1 %v3274_v0 }
 0x705   :  { %v827_v60 = vpop.f32.mrb[16].mxu1 }
 0x706   :  { %v828_v61 = vadd.f32 %v3766_v59, %v827_v60  ;;  %v2728_v62 = vpop.f32.mrb[17].mxu1  ;;  %v978_v60 = vrot.slane %v973_v57, %v3624_v7 }
 0x707   :  { %v830_v63 = vpop.f32.mrb[18].mxu1  ;;  %v982_v62 = vrot.slane %v973_v57, %v3629_v9 }
 0x708   :  { %v833_v2 = vrot.slane %v828_v61, 4  ;;  %v2729_v4 = vpop.f32.mrb[19].mxu1 }
 0x70a   :  { %v834_v6 = vadd.f32 %v833_v2, %v828_v61  ;;  %v1182_v2 = vsel %vm1180_vm5, 4294967295, %v3275_v1  ;;  %v1359_v1 = vand.u32 %v1346_v27, %v3522_v3  ;;  %v2989_v27 = vld [vmem:[#allocation2] sm:$0xff]  }
 0x70c   :  { %v835_v8 = vrot.slane %v834_v6, 2 }
 0x70e   :  { %v836_v10 = vadd.f32 %v835_v8, %v834_v6 }
 0x710   :  { %v837_v12 = vrot.slane %v836_v10, 1 }
 0x712   :  { %v838_v13 = vadd.f32 %v837_v12, %v836_v10 }
 0x714   :  { %v840_v15 = vmul.f32 0.125, %v838_v13 }
 0x716   :  { %v972_v16 = vpack.c.bf16 %v840_v15, %v828_v61 }
 0x718   :  { %1098 = vmatmul.mubr.bf16.vlgmr.msra.gmra.mrb[20].mxu1 %v972_v16  ;;  %v3781_v16 = vsel %vm1181_vm6, %v1182_v2, 0 }
 0x719   :  { %2752 = vmatprep.mubr.msk.bf16.mxu1 %vm3276_vm2, %v3274_v0 }
 0x7eb   :  { %v1099_v61 = vpop.f32.mrb[20].mxu1 }
 0x7ec   :  { %v1101_v63 = vpop.f32.mrb[21].mxu1  ;;  %v1100_v6 = vadd.f32 %v1099_v61, %v978_v60 }
 0x7ed   :  { %v1103_v4 = vpop.f32.mrb[22].mxu1  ;;  %v1102_v12 = vadd.f32 %v1101_v63, %v982_v62 }
 0x7ee   :  { %v1104_v8 = vadd.f32 %v1103_v4, %v978_v60  ;;  %v1105_v10 = vpop.f32.mrb[23].mxu1 }
 0x7ef   :  { %v1106_v13 = vadd.f32 %v1105_v10, %v982_v62 }
 0x7f0   :  { %v1109_v15 = vpack.c.bf16 %v1104_v8, %v1100_v6 }
 0x7f1   :  { %v1176_v22 = vpack.c.bf16 %v1106_v13, %v1102_v12 }
 0x7f2   :  { %2751 = vmatpush3.bf16.xpose.msra.mxu1 %v1109_v15 }
 0x7f3   :  { %v1185_v44 = vand.u32 %v3781_v16, %v1176_v22  ;;  %2782 = vmatprep.subr.bf16.mxu1 %v3274_v0 }
 0x7f5   :  { %2757 = vmatpush3.bf16.msra.mxu0 %v1185_v44  ;;  %v2990_v44 = vld [vmem:[#allocation2 + $0x8] sm:$0xff]  }
 0x7f6   :  { %2762 = vmatprep.subr.bf16.mxu0 %v3274_v0 }
 0x7f9   :  { %2753 = vmatmul.mubr.bf16.vlgmr.msra.gmra.mrb[24].mxu1 %v1108_v56 }
 0x7fa   :  { %2783 = vmatpush3.bf16.msra.mxu1 %v1359_v1  ;;  %2784 = vmatprep.mubr.msk.bf16.mxu1 %vm3276_vm2, %v3274_v0  ;;  %v2991_v1 = vld [vmem:[#allocation2 + $0x10] sm:$0xff]  }
 0x7fb   :  { %2788 = vmatprep.subr.bf16.mxu1 %v3274_v0 }
 0x801   :  { %2785 = vmatmul.mubr.msk.bf16.vlgmr.msra.gmra.mrb[28].mxu1 %vm303_vm3, %v1347_v55 }
 0x802   :  { %2804 = vmatprep.mubr.msk.bf16.mxu1 %vm3276_vm2, %v3274_v0  ;;  %2789 = vmatpush3.bf16.msra.mxu1 %v2989_v27 }
 0x803   :  { %2790 = vmatprep.subr.bf16.mxu1 %v3274_v0 }
 0x806   :  { %2791 = vmatpush3.bf16.msra.mxu1 %v2990_v44 }
 0x807   :  { %2792 = vmatprep.subr.bf16.mxu1 %v3274_v0 }
 0x80a   :  { %2793 = vmatpush3.bf16.msra.mxu1 %v2991_v1  ;;  %v2997_v1 = vld [vmem:[#allocation15] sm:$0xff]  }
 0x80b   :  { %2794 = vmatprep.subr.bf16.mxu1 %v3274_v0 }
 0x80e   :  { %2795 = vmatpush3.bf16.msra.mxu1 %v2992_v54  ;;  %v2998_v54 = vld [vmem:[#allocation15 + $0x8] sm:$0xff]  }
 0x80f   :  { %2796 = vmatprep.subr.bf16.mxu1 %v3274_v0 }
 0x8cc   :  { %v1144_v3 = vpop.f32.mrb[24].mxu1 }
 0x8cd   :  { %v2754_v56 = vpop.f32.mrb[25].mxu1  ;;  %v1152_v57 = vsel %vm1151_vm7, %v1144_v3, -inf }
 0x8ce   :  { %1153 = vmax.xlane.f32.xlu1 %v1152_v57  ;;  %v1147_v60 = vpop.f32.mrb[26].mxu1 }
 0x8cf   :  { %v2755_v61 = vpop.f32.mrb[27].mxu1  ;;  %v1156_v62 = vsel %vm1155_vm8, %v1147_v60, -inf }
 0x8d2   :  { %1157 = vmax.xlane.f32.xlu1 %v1156_v62  ;;  %v2993_v62 = vld [vmem:[#allocation2 + $0x20] sm:$0xff]  }
 0x8d3   :  { %2797 = vmatpush3.bf16.msra.mxu1 %v2993_v62 }
 0x8d4   :  { %v1395_v50 = vpop.f32.mrb[28].mxu1  ;;  %2798 = vmatprep.subr.bf16.mxu1 %v3274_v0 }
 0x8d5   :  { %v1396_v55 = vadd.f32 %v3601_v41, %v1395_v50 }
 0x8d7   :  { %v1402_v57 = vmax.f32 %v1396_v55, 0.0  ;;  %v2999_v55 = vld [vmem:[#allocation15 + $0x10] sm:$0xff]  }
 0x95b   :  { %v1154_v63 = vpop.xlane.xlu1 %1153 }
 0x95c   :  { %v1159_v2 = vsub.f32 %v1144_v3, %v1154_v63  ;;  %v2786_v3 = vpop.f32.mrb[29].mxu1 }
 0x95d   :  { %v1398_v56 = vpop.f32.mrb[30].mxu1  ;;  %v3000_v3 = vld [vmem:[#allocation15 + $0x18] sm:$0xff]  }
 0x95e   :  { %v1161_v4 = vmul.f32 1.442695, %v1159_v2  ;;  %v2787_v61 = vpop.f32.mrb[31].mxu1 }
 0x95f   :  { %v1158_v6 = vpop.xlane.xlu1 %1157 }
 0x960   :  { %3033 = vpow2.f32 %v1161_v4  ;;  %v1160_v8 = vsub.f32 %v1147_v60, %v1158_v6  ;;  %v1399_v60 = vadd.f32 %v3601_v41, %v1398_v56  ;;  %v2994_v4 = vld [vmem:[#allocation2 + $0x28] sm:$0xff]   ;;  %v2995_v6 = vld [vmem:[#allocation2 + $0x30] sm:$0xff]  }
 0x961   :  { %2799 = vmatpush3.bf16.msra.mxu1 %v2994_v4  ;;  %v3003_v56 = vld [vmem:[#allocation15 + $0x30] sm:$0xff]  }
 0x962   :  { %v1163_v10 = vmul.f32 1.442695, %v1160_v8  ;;  %v1403_v63 = vmax.f32 %v1399_v60, 0.0  ;;  %2800 = vmatprep.subr.bf16.mxu1 %v3274_v0  ;;  %v2996_v8 = vld [vmem:[#allocation2 + $0x38] sm:$0xff]  }
 0x964   :  { %3035 = vpow2.f32 %v1163_v10  ;;  %v1420_v2 = vpack.c.bf16 %v1403_v63, %v1402_v57  ;;  %v3004_v57 = vld [vmem:[#allocation15 + $0x38] sm:$0xff]  }
 0x965   :  { %2801 = vmatpush3.bf16.msra.mxu1 %v2995_v6 }
 0x966   :  { %2802 = vmatprep.subr.bf16.mxu1 %v3274_v0 }
 0x969   :  { %2803 = vmatpush3.bf16.msra.mxu1 %v2996_v8 }
 0x96a   :  { %v3034_v12 = vpop.eup %3033  ;;  %2808 = vmatprep.subr.bf16.mxu1 %v3274_v0 }
 0x96b   :  { %v1165_v13 = vsel %vm1151_vm7, %v3034_v12, 0.0 }
 0x96c   :  { %1166 = vadd.xlane.f32.xlu0 %v1165_v13  ;;  %2805 = vmatmul.mubr.bf16.vlgmr.msra.gmra.mrb[32].mxu1 %v1420_v2 }
 0x96d   :  { %2810 = vmatprep.mubr.msk.bf16.mxu1 %vm3276_vm2, %v3274_v0 }
 0x96e   :  { %v3036_v15 = vpop.eup %3035 }
 0x96f   :  { %v1168_v22 = vsel %vm1155_vm8, %v3036_v15, 0.0 }
 0x970   :  { %1169 = vadd.xlane.f32.xlu1 %v1168_v22 }
 0x9f9   :  { %v1167_v41 = vpop.xlane.xlu0 %1166 }
 0x9fa   :  { %3037 = vrcp.f32 %v1167_v41 }
 0x9fd   :  { %v1170_v10 = vpop.xlane.xlu1 %1169 }
 0x9fe   :  { %3039 = vrcp.f32 %v1170_v10 }
 0xa04   :  { %v3038_v13 = vpop.eup %3037 }
 0xa05   :  { %v1173_v27 = vmul.f32 %v3038_v13, %v3034_v12  ;;  %v3001_v12 = vld [vmem:[#allocation15 + $0x20] sm:$0xff]  }
 0xa08   :  { %v3040_v22 = vpop.eup %3039 }
 0xa09   :  { %v1174_v44 = vmul.f32 %v3040_v22, %v3036_v15  ;;  %v3002_v15 = vld [vmem:[#allocation15 + $0x28] sm:$0xff]  }
 0xa0b   :  { %v1175_v50 = vpack.c.bf16 %v1174_v44, %v1173_v27 }
 0xa0d   :  { %2759 = vmatmul.mubr.msk.bf16.vlgmr.msra.gmra.mrb[12].mxu0 %vm1151_vm7, %v1175_v50 }
 0xa0e   :  { %2763 = vmatpush3.bf16.msra.mxu0 %v2997_v1  ;;  %2778 = vmatprep.mubr.msk.bf16.mxu0 %vm3276_vm2, %v3274_v0 }
 0xa0f   :  { %2764 = vmatprep.subr.bf16.mxu0 %v3274_v0 }
 0xa12   :  { %2765 = vmatpush3.bf16.msra.mxu0 %v2998_v54 }
 0xa13   :  { %2766 = vmatprep.subr.bf16.mxu0 %v3274_v0 }
 0xa16   :  { %2767 = vmatpush3.bf16.msra.mxu0 %v2999_v55 }
 0xa17   :  { %2768 = vmatprep.subr.bf16.mxu0 %v3274_v0 }
 0xa1a   :  { %2769 = vmatpush3.bf16.msra.mxu0 %v3000_v3 }
 0xa1b   :  { %2770 = vmatprep.subr.bf16.mxu0 %v3274_v0 }
 0xa1e   :  { %2771 = vmatpush3.bf16.msra.mxu0 %v3001_v12 }
 0xa1f   :  { %2772 = vmatprep.subr.bf16.mxu0 %v3274_v0 }
 0xa22   :  { %2773 = vmatpush3.bf16.msra.mxu0 %v3002_v15 }
 0xa23   :  { %2774 = vmatprep.subr.bf16.mxu0 %v3274_v0 }
 0xa26   :  { %2775 = vmatpush3.bf16.msra.mxu0 %v3003_v56 }
 0xa27   :  { %2776 = vmatprep.subr.bf16.mxu0 %v3274_v0 }
 0xa2a   :  { %2777 = vmatpush3.bf16.msra.mxu0 %v3004_v57 }
 0xa2b   :  { %1626 = vmatprep.subr.bf16.mxu0 %v3556_v26  ;;  %v3853_v26 = vld [vmem:[%s3971_s18] ss:$0 sm:$0xff] }
 0xa3f   :  { %v1510_v60 = vpop.f32.mrb[32].mxu1 }
 0xa40   :  { %v1511_v61 = vadd.f32 %v3618_v58, %v1510_v60  ;;  %v2806_v62 = vpop.f32.mrb[33].mxu1 }
 0xa41   :  { %v1513_v63 = vpop.f32.mrb[34].mxu1 }
 0xa42   :  { %v1514_v2 = vadd.f32 %v3618_v58, %v1513_v63  ;;  %v2807_v4 = vpop.f32.mrb[35].mxu1 }
 0xa44   :  { %v1533_v6 = vpack.c.bf16 %v1514_v2, %v1511_v61  ;;  %v3005_v2 = vld [vmem:[#allocation9] sm:$0xff]  }
 0xae0   :  { %v1221_v8 = vpop.f32.mrb[12].mxu0 }
 0xae1   :  { %v2760_v41 = vpop.f32.mrb[13].mxu0 }
 0xae2   :  { %v1224_v10 = vpop.f32.mrb[14].mxu0  ;;  %v3008_v41 = vld [vmem:[#allocation9 + $0x18] sm:$0xff]  }
 0xae3   :  { %v1244_v13 = vpack.c.bf16 %v1224_v10, %v1221_v8  ;;  %v2761_v22 = vpop.f32.mrb[15].mxu0  ;;  %v3007_v8 = vld [vmem:[#allocation9 + $0x10] sm:$0xff]   ;;  %v3009_v10 = vld [vmem:[#allocation9 + $0x20] sm:$0xff]  }
 0xae4   :  { %v3011_v22 = vld [vmem:[#allocation9 + $0x30] sm:$0xff]  }
 0xae5   :  { %2779 = vmatmul.mubr.bf16.vlgmr.msra.gmra.mrb[16].mxu0 %v1244_v13  ;;  %v3010_v13 = vld [vmem:[#allocation9 + $0x28] sm:$0xff]  }
 0xae6   :  { %1627 = vmatpush1.bf16.msra.mxu0 %v3558_v28  ;;  %1658 = vmatprep.mubr.bf16.mxu0 %v3277_v53 }
 0xae7   :  { %1628 = vmatprep.subr.bf16.mxu0 %v3561_v29 }
 0xaea   :  { %1629 = vmatpush1.bf16.msra.mxu0 %v3564_v30 }
 0xaeb   :  { %1630 = vmatprep.subr.bf16.mxu0 %v3567_v31 }
 0xaee   :  { %1631 = vmatpush1.bf16.msra.mxu0 %v3570_v32 }
 0xaef   :  { %1632 = vmatprep.subr.bf16.mxu0 %v3573_v33 }
 0xaf2   :  { %1633 = vmatpush1.bf16.msra.mxu0 %v3576_v34  ;;  %v1534_v34 = vld [vmem:[%s3963_s10] sm:$0x3] }
 0xaf3   :  { %1634 = vmatprep.subr.bf16.mxu0 %v3579_v35  ;;  %v1539_v35 = vrot.slane %v1534_v34, %v3624_v7 }
 0xaf6   :  { %1635 = vmatpush1.bf16.msra.mxu0 %v3582_v36 }
 0xaf7   :  { %1636 = vmatprep.subr.bf16.mxu0 %v3585_v37  ;;  %v1543_v37 = vrot.slane %v1534_v34, %v3629_v9 }
 0xafa   :  { %1637 = vmatpush1.bf16.msra.mxu0 %v3588_v38 }
 0xafb   :  { %1638 = vmatprep.subr.bf16.mxu0 %v3591_v39 }
 0xafe   :  { %1639 = vmatpush1.bf16.msra.mxu0 %v3594_v40 }
 0xaff   :  { %1640 = vmatprep.subr.bf16.mxu0 %v3607_v51 }
 0xb02   :  { %1641 = vmatpush1.bf16.msra.mxu0 %v3609_v52 }
 0xb03   :  { %2840 = vmatprep.subr.bf16.mxu0 %v3274_v0 }
 0xb05   :  { %1659 = vmatmul.mubr.bf16.vlgmr.msra.gmra.mrb[20].mxu0 %v1533_v6  ;;  %v3006_v6 = vld [vmem:[#allocation9 + $0x8] sm:$0xff]  }
 0xb06   :  { %2856 = vmatprep.mubr.msk.bf16.mxu0 %vm3276_vm2, %v3274_v0 }
 0xbb8   :  { %v1334_v28 = vpop.f32.mrb[16].mxu0 }
 0xbb9   :  { %v1335_v29 = vadd.f32 %v3853_v26, %v1334_v28  ;;  %v2780_v30 = vpop.f32.mrb[17].mxu0  ;;  %v3012_v28 = vld [vmem:[#allocation9 + $0x38] sm:$0xff]  }
 0xbba   :  { %v1337_v31 = vpop.f32.mrb[18].mxu0  ;;  %v3014_v30 = vld [vmem:[#allocation12 + $0x8] sm:$0xff]  }
 0xbbb   :  { %1341 = vst [vmem:[%s3972_s19] sm:$0xff] %v1335_v29  ;;  %v1338_v32 = vadd.f32 %v3853_v26, %v1337_v31  ;;  %v2781_v33 = vpop.f32.mrb[19].mxu0  ;;  %v3013_v29 = vld [vmem:[#allocation12] sm:$0xff]  }
 0xbbc   :  { %2841 = vmatpush3.bf16.msra.mxu0 %v3013_v29 }
 0xbbd   :  { %1342 = vst [vmem:[%s3972_s19 + $0x8] sm:$0x1] %v1338_v32  ;;  %2842 = vmatprep.subr.bf16.mxu0 %v3274_v0 }
 0xbc0   :  { %2843 = vmatpush3.bf16.msra.mxu0 %v3014_v30 }
 0xbc1   :  { %2844 = vmatprep.subr.bf16.mxu0 %v3274_v0 }
 0xbd8   :  { %v1660_v36 = vpop.f32.mrb[20].mxu0 }
 0xbd9   :  { %v1662_v38 = vpop.f32.mrb[21].mxu0  ;;  %v1661_v40 = vadd.f32 %v1660_v36, %v1539_v35 }
 0xbda   :  { %v1664_v39 = vpop.f32.mrb[22].mxu0  ;;  %v1663_v58 = vadd.f32 %v1662_v38, %v1543_v37 }
 0xbdb   :  { %v1665_v51 = vadd.f32 %v1664_v39, %v1539_v35  ;;  %v1666_v52 = vpop.f32.mrb[23].mxu0 }
 0xbdc   :  { %v1667_v27 = vadd.f32 %v1666_v52, %v1543_v37 }
 0xbdd   :  { %v1669_v44 = vpack.c.bf16 %v1665_v51, %v1661_v40 }
 0xbde   :  { %v1722_v1 = vpack.c.bf16 %v1667_v27, %v1663_v58 }
 0xbdf   :  { %2809 = vmatpush3.bf16.xpose.msra.mxu1 %v1669_v44 }
 0xbe0   :  { %2814 = vmatprep.subr.bf16.mxu1 %v3274_v0 }
 0xbe6   :  { %2811 = vmatmul.mubr.bf16.vlgmr.msra.gmra.mrb[36].mxu1 %v3634_v24 }
 0xbe7   :  { %2815 = vmatpush3.bf16.msra.mxu1 %v1722_v1  ;;  %2816 = vmatprep.mubr.msk.bf16.mxu1 %vm3276_vm2, %v3274_v0 }
 0xbe8   :  { %2820 = vmatprep.subr.bf16.mxu1 %v3274_v0 }
 0xcb9   :  { %v1704_v50 = vpop.f32.mrb[36].mxu1 }
 0xcba   :  { %v2812_v54 = vpop.f32.mrb[37].mxu1  ;;  %v1710_v55 = vsel %vm664_vm4, %v1704_v50, -inf }
 0xcbb   :  { %1711 = vmax.xlane.f32.xlu0 %v1710_v55  ;;  %v1707_v3 = vpop.f32.mrb[38].mxu1 }
 0xcbc   :  { %v2813_v12 = vpop.f32.mrb[39].mxu1 }
 0xd48   :  { %v1712_v15 = vpop.xlane.xlu0 %1711 }
 0xd49   :  { %v1713_v56 = vsub.f32 %v1704_v50, %v1712_v15  ;;  %v2018_v50 = vld [vmem:[%s3969_s16] sm:$0x3] }
 0xd4a   :  { %v2023_v54 = vrot.slane %v2018_v50, %v3624_v7  ;;  %v2027_v3 = vrot.slane %v2018_v50, %v3629_v9 }
 0xd4b   :  { %v1714_v57 = vmul.f32 1.442695, %v1713_v56 }
 0xd4d   :  { %3041 = vpow2.f32 %v1714_v57 }
 0xd57   :  { %v3042_v60 = vpop.eup %3041 }
 0xd58   :  { %v1716_v24 = vsel %vm664_vm4, %v3042_v60, 0.0 }
 0xd59   :  { %1717 = vadd.xlane.f32.xlu1 %v1716_v24 }
 0xde6   :  { %v1718_v61 = vpop.xlane.xlu1 %1717 }
 0xde7   :  { %3043 = vrcp.f32 %v1718_v61 }
 0xdf1   :  { %v3044_v62 = vpop.eup %3043 }
 0xdf2   :  { %v1720_v63 = vmul.f32 %v3044_v62, %v3042_v60 }
 0xdf4   :  { %v1721_v4 = vpack.c.bf16 %v1720_v63, %v1720_v63 }
 0xdf6   :  { %2817 = vmatmul.mubr.msk.bf16.vlgmr.msra.gmra.mrb[40].mxu1 %vm664_vm4, %v1721_v4 }
 0xdf7   :  { %2821 = vmatpush3.bf16.msra.mxu1 %v3005_v2  ;;  %2836 = vmatprep.mubr.msk.bf16.mxu1 %vm3276_vm2, %v3274_v0 }
 0xdf8   :  { %2822 = vmatprep.subr.bf16.mxu1 %v3274_v0 }
 0xdfb   :  { %2823 = vmatpush3.bf16.msra.mxu1 %v3006_v6 }
 0xdfc   :  { %2824 = vmatprep.subr.bf16.mxu1 %v3274_v0 }
 0xdff   :  { %2825 = vmatpush3.bf16.msra.mxu1 %v3007_v8 }
 0xe00   :  { %2826 = vmatprep.subr.bf16.mxu1 %v3274_v0 }
 0xe03   :  { %2827 = vmatpush3.bf16.msra.mxu1 %v3008_v41 }
 0xe04   :  { %2828 = vmatprep.subr.bf16.mxu1 %v3274_v0 }
 0xe07   :  { %2829 = vmatpush3.bf16.msra.mxu1 %v3009_v10 }
 0xe08   :  { %2830 = vmatprep.subr.bf16.mxu1 %v3274_v0 }
 0xe0b   :  { %2831 = vmatpush3.bf16.msra.mxu1 %v3010_v13 }
 0xe0c   :  { %2832 = vmatprep.subr.bf16.mxu1 %v3274_v0 }
 0xe0f   :  { %2833 = vmatpush3.bf16.msra.mxu1 %v3011_v22 }
 0xe10   :  { %2834 = vmatprep.subr.bf16.mxu1 %v3274_v0 }
 0xe13   :  { %2835 = vmatpush3.bf16.msra.mxu1 %v3012_v28 }
 0xe14   :  { %2110 = vmatprep.subr.bf16.mxu1 %v3655_v5  ;;  %v3016_v5 = vld [vmem:[#allocation12 + $0x18] sm:$0xff]  }
 0xec9   :  { %v1760_v31 = vpop.f32.mrb[40].mxu1 }
 0xeca   :  { %v1782_v32 = vpack.c.bf16 %v1760_v31, %v1760_v31  ;;  %v2818_v33 = vpop.f32.mrb[41].mxu1 }
 0xecb   :  { %v1763_v34 = vpop.f32.mrb[42].mxu1 }
 0xecc   :  { %v2819_v35 = vpop.f32.mrb[43].mxu1  ;;  %2837 = vmatmul.mubr.bf16.vlgmr.msra.gmra.mrb[44].mxu1 %v1782_v32 }
 0xecd   :  { %2111 = vmatpush1.bf16.msra.mxu1 %v3663_v11  ;;  %2142 = vmatprep.mubr.bf16.mxu1 %v3277_v53  ;;  %v3015_v53 = vld [vmem:[#allocation12 + $0x10] sm:$0xff]   ;;  %v3017_v11 = vld [vmem:[#allocation12 + $0x20] sm:$0xff]  }
 0xece   :  { %2112 = vmatprep.subr.bf16.mxu1 %v3668_v14  ;;  %2845 = vmatpush3.bf16.msra.mxu0 %v3015_v53  ;;  %v3018_v14 = vld [vmem:[#allocation12 + $0x28] sm:$0xff]  }
 0xecf   :  { %2846 = vmatprep.subr.bf16.mxu0 %v3274_v0 }
 0xed1   :  { %2113 = vmatpush1.bf16.msra.mxu1 %v3674_v17  ;;  %v3019_v17 = vld [vmem:[#allocation12 + $0x30] sm:$0xff]  }
 0xed2   :  { %2114 = vmatprep.subr.bf16.mxu1 %v3681_v18  ;;  %2847 = vmatpush3.bf16.msra.mxu0 %v3016_v5  ;;  %v3020_v18 = vld [vmem:[#allocation12 + $0x38] sm:$0xff]  }
 0xed3   :  { %2848 = vmatprep.subr.bf16.mxu0 %v3274_v0 }
 0xed5   :  { %2115 = vmatpush1.bf16.msra.mxu1 %v3687_v19  ;;  %v2512_v19 = vld [vmem:[%s3989_s22 + $0x10] sm:$0xff] }
 0xed6   :  { %2116 = vmatprep.subr.bf16.mxu1 %v3693_v20  ;;  %2849 = vmatpush3.bf16.msra.mxu0 %v3017_v11  ;;  %v2513_v20 = vld [vmem:[%s3989_s22 + $0x18] sm:$0x1] }
 0xed7   :  { %2850 = vmatprep.subr.bf16.mxu0 %v3274_v0 }
 0xed9   :  { %2117 = vmatpush1.bf16.msra.mxu1 %v3699_v21  ;;  %v1904_v21 = vpack.c.bf16 %v2513_v20, %v2512_v19  ;;  %v3023_v19 = vld [vmem:[#allocation15 + $0x10] sm:$0xff]   ;;  %v3024_v20 = vld [vmem:[#allocation15 + $0x18] sm:$0xff]  }
 0xeda   :  { %2118 = vmatprep.subr.bf16.mxu1 %v3707_v23  ;;  %2851 = vmatpush3.bf16.msra.mxu0 %v3018_v14  ;;  %v3021_v14 = vld [vmem:[#allocation15] sm:$0xff]  }
 0xedb   :  { %2852 = vmatprep.subr.bf16.mxu0 %v3274_v0 }
 0xedd   :  { %2119 = vmatpush1.bf16.msra.mxu1 %v3712_v25 }
 0xede   :  { %2120 = vmatprep.subr.bf16.mxu1 %v3720_v42  ;;  %2853 = vmatpush3.bf16.msra.mxu0 %v3019_v17 }
 0xedf   :  { %2854 = vmatprep.subr.bf16.mxu0 %v3274_v0 }
 0xee1   :  { %2121 = vmatpush1.bf16.msra.mxu1 %v3725_v43 }
 0xee2   :  { %2122 = vmatprep.subr.bf16.mxu1 %v3733_v45  ;;  %2855 = vmatpush3.bf16.msra.mxu0 %v3020_v18  ;;  %v3022_v18 = vld [vmem:[#allocation15 + $0x8] sm:$0xff]  }
 0xee3   :  { %2860 = vmatprep.subr.bf16.mxu0 %v3274_v0 }
 0xee5   :  { %2123 = vmatpush1.bf16.msra.mxu1 %v3738_v46  ;;  %2857 = vmatmul.mubr.bf16.vlgmr.msra.gmra.mrb[24].mxu0 %v1904_v21  ;;  %v3025_v21 = vld [vmem:[#allocation15 + $0x20] sm:$0xff]  }
 0xee6   :  { %2124 = vmatprep.subr.bf16.mxu1 %v3746_v48  ;;  %2862 = vmatprep.mubr.msk.bf16.mxu0 %vm3276_vm2, %v3274_v0 }
 0xee9   :  { %2125 = vmatpush1.bf16.msra.mxu1 %v3751_v49 }
 0xf9f   :  { %v1872_v23 = vpop.f32.mrb[44].mxu1 }
 0xfa0   :  { %v1873_v25 = vadd.f32 %v3766_v59, %v1872_v23  ;;  %v2838_v42 = vpop.f32.mrb[45].mxu1  ;;  %v3026_v23 = vld [vmem:[#allocation15 + $0x28] sm:$0xff]  }
 0xfa1   :  { %v1875_v43 = vpop.f32.mrb[46].mxu1  ;;  %v3028_v42 = vld [vmem:[#allocation15 + $0x38] sm:$0xff]  }
 0xfa2   :  { %v1878_v45 = vrot.slane %v1873_v25, 4  ;;  %v2839_v46 = vpop.f32.mrb[47].mxu1 }
 0xfa4   :  { %v1879_v48 = vadd.f32 %v1878_v45, %v1873_v25 }
 0xfa6   :  { %v1880_v49 = vrot.slane %v1879_v48, 2 }
 0xfa8   :  { %v1881_v36 = vadd.f32 %v1880_v49, %v1879_v48 }
 0xfaa   :  { %v1882_v37 = vrot.slane %v1881_v36, 1 }
 0xfac   :  { %v1883_v38 = vadd.f32 %v1882_v37, %v1881_v36 }
 0xfae   :  { %v1884_v39 = vmul.f32 0.125, %v1883_v38 }
 0xfb0   :  { %v2017_v40 = vpack.c.bf16 %v1884_v39, %v1873_v25  ;;  %v3027_v25 = vld [vmem:[#allocation15 + $0x30] sm:$0xff]  }
 0xfb2   :  { %2143 = vmatmul.mubr.bf16.vlgmr.msra.gmra.mrb[48].mxu1 %v2017_v40 }
 0xfb8   :  { %v1994_v51 = vpop.f32.mrb[24].mxu0 }
 0xfb9   :  { %v2858_v52 = vpop.f32.mrb[25].mxu0  ;;  %v1995_v44 = vadd.f32 %v3771_v47, %v1994_v51 }
 0xfba   :  { %v1997_v58 = vpop.f32.mrb[26].mxu0 }
 0xfbb   :  { %v2859_v27 = vpop.f32.mrb[27].mxu0  ;;  %v1998_v59 = vadd.f32 %v3771_v47, %v1997_v58 }
 0xfbd   :  { %v2153_v1 = vpack.c.bf16 %v1998_v59, %v1995_v44 }
0x1085   :  { %v2144_v55 = vpop.f32.mrb[48].mxu1 }
0x1086   :  { %v2146_v12 = vpop.f32.mrb[49].mxu1  ;;  %v2145_v56 = vadd.f32 %v2144_v55, %v2023_v54 }
0x1087   :  { %v2148_v15 = vpop.f32.mrb[50].mxu1  ;;  %v2147_v24 = vadd.f32 %v2146_v12, %v2027_v3 }
0x1088   :  { %v2149_v57 = vadd.f32 %v2148_v15, %v2023_v54  ;;  %v2150_v60 = vpop.f32.mrb[51].mxu1 }
0x1089   :  { %v2151_v61 = vadd.f32 %v2150_v60, %v2027_v3 }
0x108a   :  { %v2154_v62 = vpack.c.bf16 %v2149_v57, %v2145_v56 }
0x108b   :  { %v2219_v63 = vpack.c.bf16 %v2151_v61, %v2147_v24 }
0x108c   :  { %2861 = vmatpush3.bf16.xpose.msra.mxu0 %v2154_v62 }
0x108d   :  { %2866 = vmatprep.subr.bf16.mxu0 %v3274_v0  ;;  %v2224_v47 = vand.u32 %v2219_v63, %v3781_v16 }
0x1093   :  { %2863 = vmatmul.mubr.bf16.vlgmr.msra.gmra.mrb[28].mxu0 %v2153_v1 }
0x1094   :  { %2867 = vmatpush3.bf16.msra.mxu0 %v2224_v47  ;;  %2868 = vmatprep.mubr.msk.bf16.mxu0 %vm3276_vm2, %v3274_v0 }
0x1095   :  { %2872 = vmatprep.subr.bf16.mxu0 %v3274_v0 }
0x1166   :  { %v2189_v7 = vpop.f32.mrb[28].mxu0 }
0x1167   :  { %v2864_v9 = vpop.f32.mrb[29].mxu0  ;;  %v2196_v2 = vsel %vm1151_vm7, %v2189_v7, -inf }
0x1168   :  { %2197 = vmax.xlane.f32.xlu0 %v2196_v2  ;;  %v2192_v4 = vpop.f32.mrb[30].mxu0 }
0x1169   :  { %v2865_v6 = vpop.f32.mrb[31].mxu0  ;;  %v2199_v8 = vsel %vm1155_vm8, %v2192_v4, -inf }
0x116a   :  { %2200 = vmax.xlane.f32.xlu1 %v2199_v8 }
0x11f5   :  { %v2198_v41 = vpop.xlane.xlu0 %2197 }
0x11f6   :  { %v2202_v10 = vsub.f32 %v2189_v7, %v2198_v41 }
0x11f7   :  { %v2201_v16 = vpop.xlane.xlu1 %2200 }
0x11f8   :  { %v2204_v13 = vmul.f32 1.442695, %v2202_v10  ;;  %v2203_v22 = vsub.f32 %v2192_v4, %v2201_v16 }
0x11fa   :  { %3045 = vpow2.f32 %v2204_v13  ;;  %v2206_v28 = vmul.f32 1.442695, %v2203_v22 }
0x11fc   :  { %3047 = vpow2.f32 %v2206_v28 }
0x1204   :  { %v3046_v29 = vpop.eup %3045 }
0x1205   :  { %v2208_v30 = vsel %vm1151_vm7, %v3046_v29, 0.0 }
0x1206   :  { %v3048_v31 = vpop.eup %3047  ;;  %2209 = vadd.xlane.f32.xlu0 %v2208_v30 }
0x1207   :  { %v2211_v32 = vsel %vm1155_vm8, %v3048_v31, 0.0 }
0x1208   :  { %2212 = vadd.xlane.f32.xlu1 %v2211_v32 }
0x1293   :  { %v2210_v33 = vpop.xlane.xlu0 %2209 }
0x1294   :  { %3049 = vrcp.f32 %v2210_v33 }
0x1295   :  { %v2213_v34 = vpop.xlane.xlu1 %2212 }
0x1296   :  { %3051 = vrcp.f32 %v2213_v34 }
0x129e   :  { %v3050_v35 = vpop.eup %3049 }
0x129f   :  { %v2216_v5 = vmul.f32 %v3050_v35, %v3046_v29 }
0x12a0   :  { %v3052_v53 = vpop.eup %3051 }
0x12a1   :  { %v2217_v11 = vmul.f32 %v3052_v53, %v3048_v31 }
0x12a3   :  { %v2218_v17 = vpack.c.bf16 %v2217_v11, %v2216_v5 }
0x12a5   :  { %2869 = vmatmul.mubr.msk.bf16.vlgmr.msra.gmra.mrb[32].mxu0 %vm1151_vm7, %v2218_v17 }
0x12a6   :  { %2873 = vmatpush3.bf16.msra.mxu0 %v3021_v14  ;;  %2888 = vmatprep.mubr.msk.bf16.mxu0 %vm3276_vm2, %v3274_v0 }
0x12a7   :  { %2874 = vmatprep.subr.bf16.mxu0 %v3274_v0 }
0x12aa   :  { %2875 = vmatpush3.bf16.msra.mxu0 %v3022_v18 }
0x12ab   :  { %2876 = vmatprep.subr.bf16.mxu0 %v3274_v0 }
0x12ae   :  { %2877 = vmatpush3.bf16.msra.mxu0 %v3023_v19 }
0x12af   :  { %2878 = vmatprep.subr.bf16.mxu0 %v3274_v0 }
0x12b2   :  { %2879 = vmatpush3.bf16.msra.mxu0 %v3024_v20 }
0x12b3   :  { %2880 = vmatprep.subr.bf16.mxu0 %v3274_v0 }
0x12b6   :  { %2881 = vmatpush3.bf16.msra.mxu0 %v3025_v21 }
0x12b7   :  { %2882 = vmatprep.subr.bf16.mxu0 %v3274_v0 }
0x12ba   :  { %2883 = vmatpush3.bf16.msra.mxu0 %v3026_v23 }
0x12bb   :  { %2884 = vmatprep.subr.bf16.mxu0 %v3274_v0 }
0x12be   :  { %2885 = vmatpush3.bf16.msra.mxu0 %v3027_v25 }
0x12bf   :  { %2886 = vmatprep.subr.bf16.mxu0 %v3274_v0 }
0x12c2   :  { %2887 = vmatpush3.bf16.msra.mxu0 %v3028_v42 }
0x1378   :  { %v2260_v43 = vpop.f32.mrb[32].mxu0 }
0x1379   :  { %v2870_v45 = vpop.f32.mrb[33].mxu0 }
0x137a   :  { %v2263_v46 = vpop.f32.mrb[34].mxu0 }
0x137b   :  { %v2283_v48 = vpack.c.bf16 %v2263_v46, %v2260_v43  ;;  %v2871_v49 = vpop.f32.mrb[35].mxu0 }
0x137d   :  { %2889 = vmatmul.mubr.bf16.vlgmr.msra.gmra.mrb[36].mxu0 %v2283_v48 }
0x1450   :  { %v2373_v36 = vpop.f32.mrb[36].mxu0 }
0x1451   :  { %v2374_v37 = vadd.f32 %v3853_v26, %v2373_v36  ;;  %v2890_v38 = vpop.f32.mrb[37].mxu0 }
0x1452   :  { %v2376_v39 = vpop.f32.mrb[38].mxu0 }
0x1453   :  { %2549 = vst [vmem:[%s3972_s19 + $0x10] sm:$0xff] %v2374_v37  ;;  %v2377_v40 = vadd.f32 %v3853_v26, %v2376_v39  ;;  %v2891_v0 = vpop.f32.mrb[39].mxu0 }
0x1455   :  { %2550 = vst [vmem:[%s3972_s19 + $0x18] sm:$0x1] %v2377_v40 }
0x1456   :  { %2387 = vsyncpa [#allocation3], 1 }
0x1457   :  { %2388 = vsyncpa [#allocation5], 1 }
0x1458   :  { %2389 = vsyncpa [#allocation8], 1 }
0x1459   :  { %2390 = vsyncpa [#allocation11], 1 }
0x145a   :  { %2391 = vsyncpa [#allocation14], 1 }

</bundles_post_ra>
